<compile_context>
chip_gen: v7x
topology: tpu7x:2x2x1
jax: 0.10.0
libtpu: 0.0.40
codegen_flags: <defaults>
</compile_context>

<pallas_src>
import functools

import jax
import jax.numpy as jnp
from jax import lax
from jax.experimental import pallas as pl
from jax.experimental.pallas import tpu as pltpu


def _vmem():
    return pl.BlockSpec(memory_space=pltpu.MemorySpace.VMEM)


# ----------------------------------------------------------------------------
# Kernel 1: fused bidirectional GRU recurrence + length-masked max-pool.
#
#   pf_ref / pb_ref : (T, B, 3H) precomputed x @ W_ih (+ folded biases) for the
#                     forward / backward direction, time-major, gate order [r|z|n]
#   whh_ref         : (2, H, 3H) stacked hidden->hidden weights (fwd, bwd)
#   bhn_ref         : (2, 1, H)  hidden bias of the "n" gate (fwd, bwd)
#   lens_ref        : (B, 1) int32 valid lengths
#   out_ref         : (B, 2H)  [maxpool(fwd hidden) | maxpool(bwd hidden)]
#
# bwd_full_reversal=True  -> backward direction reads pb[T-1-t] (PyTorch
#                            *unpacked* nn.GRU: pads are processed); output at
#                            step t is valid iff t >= T - len.
# bwd_full_reversal=False -> pb was already reversed within each row's valid
#                            length at the JAX level (exact-length per-doc runs
#                            of the reference); output valid iff t < len.
# ----------------------------------------------------------------------------
def _bigru_pool_kernel(pf_ref, pb_ref, whh_ref, bhn_ref, lens_ref, out_ref,
                       *, bwd_full_reversal):
    T, B, G = pf_ref.shape
    H = G // 3
    f32 = jnp.float32

    whh_f = whh_ref[0]          # (H, 3H)
    whh_b = whh_ref[1]
    bhn_f = bhn_ref[0]          # (1, H)
    bhn_b = bhn_ref[1]
    lens = lens_ref[...]        # (B, 1) int32

    def gru_step(p_t, h, whh, bhn):
        # single fused MXU push per step: (B,H) @ (H,3H) -> [r|z|n]
        hh = jnp.dot(h, whh, preferred_element_type=f32)
        r = jax.nn.sigmoid(p_t[:, 0:H] + hh[:, 0:H])
        z = jax.nn.sigmoid(p_t[:, H:2 * H] + hh[:, H:2 * H])
        n = jnp.tanh(p_t[:, 2 * H:] + r * (hh[:, 2 * H:] + bhn))
        return (1.0 - z) * n + z * h

    def step(t, carry):
        h_f, h_b, m_f, m_b = carry
        # forward direction
        h_f = gru_step(pf_ref[t], h_f, whh_f, bhn_f)
        valid_f = lens > t
        # backward direction (interleaved with fwd for latency hiding)
        if bwd_full_reversal:
            h_b = gru_step(pb_ref[T - 1 - t], h_b, whh_b, bhn_b)
            valid_b = t >= (T - lens)
        else:
            h_b = gru_step(pb_ref[t], h_b, whh_b, bhn_b)
            valid_b = valid_f
        # fused length-masked running max (replaces separate max-pool kernel)
        m_f = jnp.where(valid_f, jnp.maximum(m_f, h_f), m_f)
        m_b = jnp.where(valid_b, jnp.maximum(m_b, h_b), m_b)
        return h_f, h_b, m_f, m_b

    z0 = jnp.zeros((B, H), f32)
    ninf = jnp.full((B, H), -jnp.inf, f32)
    _, _, m_f, m_b = lax.fori_loop(0, T, step, (z0, z0, ninf, ninf),
                                   unroll=True)
    out = jnp.concatenate([m_f, m_b], axis=1)          # (B, 2H)
    # zero rows for empty sequences (max_pool1d semantics of the reference)
    out_ref[...] = jnp.where(lens > 0, out, 0.0)


def bigru_maxpool(x_f, lens, p, *, x_b=None, block_b=256):
    """Fused bi-GRU + masked max-pool.

    x_f : (B, T, Din) forward-time input (batch-major).
    x_b : optional (B, T, Din) backward-direction stream, already reversed
          within each row's valid length. If None, the backward direction uses
          the full time reversal of x_f (indexed inside the kernel).
    lens: (B,) int32 valid lengths.
    p   : dict with "wih" (2,Din,3H), "whh" (2,H,3H), "bias" (2,3H), "bhn" (2,1,H).
    Returns (B, 2H).
    """
    B, T, _ = x_f.shape
    H = p["whh"].shape[-1] // 3
    G = 3 * H
    full_rev = x_b is None

    # Hoisted input projection: one large *parallel* matmul per direction
    # (off the serial critical path; only h @ W_hh remains in the recurrence).
    # The combined r/z biases (b_ih + b_hh) are folded in here.
    pf = jnp.einsum("btd,dg->tbg", x_f, p["wih"][0]) + p["bias"][0]
    pb_src = x_f if full_rev else x_b
    pb = jnp.einsum("btd,dg->tbg", pb_src, p["wih"][1]) + p["bias"][1]
    lens2 = lens.reshape(B, 1).astype(jnp.int32)

    # Batch tiling: parallel grid axis -> megacore sharding on v7x and bounded
    # per-step VMEM footprint when B is large. (Demo shapes use a single tile.)
    if B <= block_b:
        tb, Bp = B, B
    else:
        tb = block_b                              # multiple of 8
        Bp = pl.cdiv(B, tb) * tb
        pad = Bp - B
        if pad:
            pf = jnp.pad(pf, ((0, 0), (0, pad), (0, 0)))
            pb = jnp.pad(pb, ((0, 0), (0, pad), (0, 0)))
            lens2 = jnp.pad(lens2, ((0, pad), (0, 0)))
    grid = (Bp // tb,)

    kernel = functools.partial(_bigru_pool_kernel, bwd_full_reversal=full_rev)
    out = pl.pallas_call(
        kernel,
        out_shape=jax.ShapeDtypeStruct((Bp, 2 * H), jnp.float32),
        grid=grid,
        in_specs=[
            pl.BlockSpec((T, tb, G), lambda i: (0, i, 0)),   # pf
            pl.BlockSpec((T, tb, G), lambda i: (0, i, 0)),   # pb
            pl.BlockSpec((2, H, G), lambda i: (0, 0, 0)),    # whh (both dirs)
            pl.BlockSpec((2, 1, H), lambda i: (0, 0, 0)),    # bhn (both dirs)
            pl.BlockSpec((tb, 1), lambda i: (i, 0)),         # lens
        ],
        out_specs=pl.BlockSpec((tb, 2 * H), lambda i: (i, 0)),
        compiler_params=pltpu.CompilerParams(
            dimension_semantics=("parallel",)),
    )(pf, pb, p["whh"], p["bhn"], lens2)
    return out[:B]


# ----------------------------------------------------------------------------
# Kernel 2: all scoring math (content / bilinear salience / position / bias).
# Bilinear weights are passed pre-transposed; small params are packed.
# ----------------------------------------------------------------------------
def _score_kernel(sent_ref, doc_ref, blog_ref, ctx_ref,
                  dpos_ref, sdpos_ref, spos_ref,
                  wc_ref, adsal_t_ref, assal_t_ref, wpos_ref, bias_ref,
                  docp_ref, sentp_ref):
    f32 = jnp.float32
    sent_vec = sent_ref[...]       # (ns, 2H)
    doc_vec = doc_ref[...]         # (nd, 2H)
    blog = blog_ref[...]           # (1, 2H)
    wc = wc_ref[...]               # (2, 2H): [w_dc ; w_sc]
    wpos = wpos_ref[...]           # (3, P) : [w_dpos ; w_sdpos ; w_spos]
    bias = bias_ref[...]           # (1, 2) : [doc_bias, sent_bias]

    # --- document scores ---
    dc = jnp.sum(doc_vec * wc[0:1, :], axis=1, keepdims=True)                   # (nd,1)
    v = jnp.dot(blog, adsal_t_ref[...], preferred_element_type=f32)             # (1,2H)
    dsal = jnp.sum(doc_vec * v, axis=1, keepdims=True)                          # (nd,1)
    dpos = jnp.sum(dpos_ref[...] * wpos[0:1, :], axis=1, keepdims=True)         # (nd,1)
    docp_ref[...] = dc + dsal + dpos + bias[:, 0:1]

    # --- sentence scores ---
    sc = jnp.sum(sent_vec * wc[1:2, :], axis=1, keepdims=True)                  # (ns,1)
    ctxp = jnp.dot(ctx_ref[...], assal_t_ref[...], preferred_element_type=f32)  # (ns,2H)
    ssal = jnp.sum(sent_vec * ctxp, axis=1, keepdims=True)                       # (ns,1)
    sdp = jnp.sum(sdpos_ref[...] * wpos[1:2, :], axis=1, keepdims=True)
    sp = jnp.sum(spos_ref[...] * wpos[2:3, :], axis=1, keepdims=True)
    sentp_ref[...] = sc + ssal + sdp + sp + bias[:, 1:2]


def score(sent_vec, doc_vec, blog_vec, ctx, dpos_emb, sdpos_emb, spos_emb, params):
    nd = doc_vec.shape[0]
    ns = sent_vec.shape[0]
    doc_probs, sent_probs = pl.pallas_call(
        _score_kernel,
        out_shape=(jax.ShapeDtypeStruct((nd, 1), jnp.float32),
                   jax.ShapeDtypeStruct((ns, 1), jnp.float32)),
        in_specs=[_vmem()] * 12,
        out_specs=(_vmem(), _vmem()),
    )(sent_vec, doc_vec, blog_vec, ctx, dpos_emb, sdpos_emb, spos_emb,
      params["wc"], params["adsal_t"], params["assal_t"],
      params["wpos"], params["biases"])
    return doc_probs, sent_probs


# ----------------------------------------------------------------------------
# Parameters (deterministic init, shapes mirror Model2.__init__; GRU weights
# are re-packed at init time into the fused/stacked kernel layout).
# ----------------------------------------------------------------------------
def init_params(key, V, D, H, P, pos_doc_size, pos_sent_size):
    ks = iter(jax.random.split(key, 64))

    def u(shape, bound):
        return jax.random.uniform(next(ks), shape, jnp.float32, -bound, bound)

    embed = jax.random.normal(next(ks), (V, D), jnp.float32)
    embed = embed.at[0].set(0.0)  # padding_idx=0

    def gru_params(din):
        bound = 1.0 / (H ** 0.5)

        def one_dir():
            # PyTorch nn.GRU layout, gate order [r, z, n]
            w_ih = u((3 * H, din), bound)
            w_hh = u((3 * H, H), bound)
            b_ih = u((3 * H,), bound)
            b_hh = u((3 * H,), bound)
            wih_t = jnp.transpose(w_ih)                       # (din, 3H)
            whh_t = jnp.transpose(w_hh)                       # (H, 3H)
            # fold b_ih + b_hh for r/z into the hoisted projection; keep b_hn apart
            bias = jnp.concatenate([b_ih[:2 * H] + b_hh[:2 * H], b_ih[2 * H:]])
            bhn = b_hh[2 * H:].reshape(1, H)
            return wih_t, whh_t, bias, bhn

        f = one_dir()
        b = one_dir()
        return dict(wih=jnp.stack([f[0], b[0]]),    # (2, din, 3H)
                    whh=jnp.stack([f[1], b[1]]),    # (2, H, 3H)
                    bias=jnp.stack([f[2], b[2]]),   # (2, 3H)
                    bhn=jnp.stack([f[3], b[3]]))    # (2, 1, H)

    word = gru_params(D)
    sent = gru_params(2 * H)
    doc = gru_params(2 * H)

    doc_pos_embed = jax.random.normal(next(ks), (pos_doc_size, P), jnp.float32)
    sent_pos_embed = jax.random.normal(next(ks), (pos_sent_size, P), jnp.float32)

    lb = lambda fan_in: 1.0 / (fan_in ** 0.5)
    w_dc = u((1, 2 * H), lb(2 * H))
    w_sc = u((1, 2 * H), lb(2 * H))
    A_dsal = u((2 * H, 2 * H), lb(2 * H))       # Bilinear(2H, 2H, 1) weight[0]
    A_ssal = u((2 * H, 4 * H), lb(2 * H))       # Bilinear(2H, 4H, 1) weight[0]
    w_dpos = u((1, P), lb(P))
    w_sdpos = u((1, P), lb(P))
    w_spos = u((1, P), lb(P))
    doc_bias = u((1, 1), 0.1)
    sent_bias = u((1, 1), 0.1)

    return dict(
        embed=embed, word=word, sent=sent, doc=doc,
        doc_pos_embed=doc_pos_embed, sent_pos_embed=sent_pos_embed,
        wc=jnp.concatenate([w_dc, w_sc], axis=0),             # (2, 2H)
        adsal_t=jnp.transpose(A_dsal),                        # pre-transposed (2H, 2H)
        assal_t=jnp.transpose(A_ssal),                        # pre-transposed (4H, 2H)
        wpos=jnp.concatenate([w_dpos, w_sdpos, w_spos], 0),   # (3, P)
        biases=jnp.concatenate([doc_bias, sent_bias], 1),     # (1, 2)
    )


# ----------------------------------------------------------------------------
# Full forward (Model2.forward)
# ----------------------------------------------------------------------------
def forward(x_ids, doc_lens, params, pos_doc_size, pos_sent_size, H):
    # x_ids: (N_sents, T_words) int32; doc_lens: python list, sum == N_sents
    N_sents, _ = x_ids.shape
    nd = len(doc_lens)

    # sent_lens = sum(sign(x), dim=1)
    sent_lens = jnp.sum((x_ids > 0).astype(jnp.int32), axis=1)

    # embedding lookup (glue gather); embed_frozen only affects grads -> no-op
    emb = params["embed"][x_ids]                                  # (N, T, D)

    # 1) word-level bi-GRU + fused masked max-pool -> sentence vectors.
    #    Reference runs unpacked nn.GRU (pads processed), so the backward
    #    direction is the full time reversal (done via in-kernel indexing).
    sent_vec = bigru_maxpool(emb, sent_lens, params["word"])      # (N, 2H)

    # 2) sentence-level bi-GRU, batched over docs (padded to Lmax) instead of
    #    a per-doc Python loop. The reference runs each doc at exact length,
    #    so the backward stream is reversed *within* each doc's length.
    Lmax = max(doc_lens)
    idx_f, idx_b = [], []
    start = 0
    for L in doc_lens:
        idx_f.append(list(range(start, start + L)) + [0] * (Lmax - L))
        idx_b.append(list(range(start + L - 1, start - 1, -1)) + [0] * (Lmax - L))
        start += L
    docs_f = sent_vec[jnp.array(idx_f, dtype=jnp.int32)]          # (nd, Lmax, 2H)
    docs_b = sent_vec[jnp.array(idx_b, dtype=jnp.int32)]          # (nd, Lmax, 2H)
    doc_len_arr = jnp.array(doc_lens, dtype=jnp.int32)
    doc_vec = bigru_maxpool(docs_f, doc_len_arr, params["sent"],
                            x_b=docs_b)                            # (nd, 2H)

    # 3) document-level bi-GRU over the single doc sequence -> blog vector
    blog_vec = bigru_maxpool(doc_vec[None], jnp.array([nd], jnp.int32),
                             params["doc"])                        # (1, 2H)

    # position indices (python ints, same truncation as the reference)
    doc_num = float(nd)
    doc_indices = [int(i * pos_doc_size / doc_num) for i in range(nd)]
    sent_doc_of, sent_pos_idx = [], []
    for i, L in enumerate(doc_lens):
        for j in range(L):
            sent_doc_of.append(i)
            sent_pos_idx.append(int(j * pos_sent_size / float(L)))

    dpos_emb = params["doc_pos_embed"][jnp.array(doc_indices)]                        # (nd, P)
    sdpos_emb = params["doc_pos_embed"][jnp.array([doc_indices[i] for i in sent_doc_of])]  # (ns, P)
    spos_emb = params["sent_pos_embed"][jnp.array(sent_pos_idx)]                      # (ns, P)

    # per-sentence context = cat(blog_vec, doc_vec[doc of sentence])
    ctx = jnp.concatenate(
        [jnp.broadcast_to(blog_vec, (N_sents, 2 * H)),
         doc_vec[jnp.array(sent_doc_of)]], axis=1)                                    # (ns, 4H)

    doc_probs, sent_probs = score(sent_vec, doc_vec, blog_vec, ctx,
                                  dpos_emb, sdpos_emb, spos_emb, params)
    return jnp.squeeze(sent_probs), jnp.squeeze(doc_probs)


# ----------------------------------------------------------------------------
if __name__ == "__main__":
    # args: embed_num=V, embed_dim=D, hidden_size=H, pos_dim=P
    V, D, H, P = 50, 32, 16, 8
    pos_doc_size, pos_sent_size = 10, 10
    doc_lens = [2, 4]            # 2 docs, 6 sentences total
    T_words = 8
    N_sents = sum(doc_lens)

    key = jax.random.PRNGKey(0)
    kp, kx, kl = jax.random.split(key, 3)
    params = init_params(kp, V, D, H, P, pos_doc_size, pos_sent_size)

    # token ids: valid tokens (1..V-1) in a prefix, zero-padded tail
    ids = jax.random.randint(kx, (N_sents, T_words), 1, V)
    lens = jax.random.randint(kl, (N_sents,), 1, T_words + 1)
    pos = jnp.arange(T_words)[None, :]
    x_ids = jnp.where(pos < lens[:, None], ids, 0).astype(jnp.int32)

    sent_probs, doc_probs = forward(x_ids, doc_lens, params,
                                    pos_doc_size, pos_sent_size, H)
    jax.block_until_ready((sent_probs, doc_probs))
    assert sent_probs.shape == (N_sents,)
    assert doc_probs.shape == (len(doc_lens),)
    assert bool(jnp.all(jnp.isfinite(sent_probs))) and bool(jnp.all(jnp.isfinite(doc_probs)))
    print("KERNEL_OK")
</pallas_src>

<mosaic_0001>
module attributes {stable_mosaic.version = 11 : i64} {
  func.func @_bigru_pool_kernel(%arg0: i32, %arg1: memref<8x6x48xf32, #tpu.memory_space<vmem>>, %arg2: memref<8x6x48xf32, #tpu.memory_space<vmem>>, %arg3: memref<2x16x48xf32, #tpu.memory_space<vmem>>, %arg4: memref<2x1x16xf32, #tpu.memory_space<vmem>>, %arg5: memref<6x1xi32, #tpu.memory_space<vmem>>, %arg6: memref<6x32xf32, #tpu.memory_space<vmem>>) attributes {dimension_semantics = [#tpu.dimension_semantics<parallel>], iteration_bounds = array<i64: 1>, scalar_prefetch = 0 : i64, scratch_operands = 0 : i64, tpu.core_type = #tpu.core_type<tc>, window_params = [{transform_indices = @transform_0, window_bounds = array<i64: 8, 6, 48>}, {transform_indices = @transform_1, window_bounds = array<i64: 8, 6, 48>}, {pipeline_mode = #tpu.pipeline_mode<synchronous>, transform_indices = @transform_2, window_bounds = array<i64: 2, 16, 48>}, {pipeline_mode = #tpu.pipeline_mode<synchronous>, transform_indices = @transform_3, window_bounds = array<i64: 2, 1, 16>}, {transform_indices = @transform_4, window_bounds = array<i64: 6, 1>}, {transform_indices = @transform_5, window_bounds = array<i64: 6, 32>}]} {
    %c0 = arith.constant 0 : index
    %c0_0 = arith.constant 0 : index
    %c0_1 = arith.constant 0 : index
    %0 = vector.load %arg3[%c0, %c0_0, %c0_1] : memref<2x16x48xf32, #tpu.memory_space<vmem>>, vector<1x16x48xf32>
    %1 = vector.shape_cast %0 : vector<1x16x48xf32> to vector<16x48xf32>
    %c1 = arith.constant 1 : index
    %c0_2 = arith.constant 0 : index
    %c0_3 = arith.constant 0 : index
    %2 = vector.load %arg3[%c1, %c0_2, %c0_3] : memref<2x16x48xf32, #tpu.memory_space<vmem>>, vector<1x16x48xf32>
    %3 = vector.shape_cast %2 : vector<1x16x48xf32> to vector<16x48xf32>
    %c0_4 = arith.constant 0 : index
    %c0_5 = arith.constant 0 : index
    %c0_6 = arith.constant 0 : index
    %4 = vector.load %arg4[%c0_4, %c0_5, %c0_6] : memref<2x1x16xf32, #tpu.memory_space<vmem>>, vector<1x1x16xf32>
    %5 = vector.shape_cast %4 : vector<1x1x16xf32> to vector<1x16xf32>
    %c1_7 = arith.constant 1 : index
    %c0_8 = arith.constant 0 : index
    %c0_9 = arith.constant 0 : index
    %6 = vector.load %arg4[%c1_7, %c0_8, %c0_9] : memref<2x1x16xf32, #tpu.memory_space<vmem>>, vector<1x1x16xf32>
    %7 = vector.shape_cast %6 : vector<1x1x16xf32> to vector<1x16xf32>
    %c0_10 = arith.constant 0 : index
    %c0_11 = arith.constant 0 : index
    %8 = vector.load %arg5[%c0_10, %c0_11] : memref<6x1xi32, #tpu.memory_space<vmem>>, vector<6x1xi32>
    %cst = arith.constant 0.000000e+00 : f32
    %9 = vector.broadcast %cst : f32 to vector<6x16xf32>
    %cst_12 = arith.constant 0xFF800000 : f32
    %10 = vector.broadcast %cst_12 : f32 to vector<6x16xf32>
    %c0_i32 = arith.constant 0 : i32
    %11 = arith.index_cast %c0_i32 : i32 to index
    %c0_13 = arith.constant 0 : index
    %c0_14 = arith.constant 0 : index
    %12 = vector.load %arg1[%11, %c0_13, %c0_14] : memref<8x6x48xf32, #tpu.memory_space<vmem>>, vector<1x6x48xf32>
    %13 = vector.shape_cast %12 : vector<1x6x48xf32> to vector<6x48xf32>
    %cst_15 = arith.constant dense<0.000000e+00> : vector<6x48xf32>
    %14 = tpu.matmul %9, %1, %cst_15 {dimension_numbers = #tpu.dot_dimension_numbers<[1], [0], [0], [1], [0, 0, 1, 1], [], []>} : vector<6x16xf32>, vector<16x48xf32>, vector<6x48xf32> -> vector<6x48xf32>
    %15 = vector.extract_strided_slice %13 {offsets = [0, 0], sizes = [6, 16], strides = [1, 1]} : vector<6x48xf32> to vector<6x16xf32>
    %16 = vector.extract_strided_slice %14 {offsets = [0, 0], sizes = [6, 16], strides = [1, 1]} : vector<6x48xf32> to vector<6x16xf32>
    %17 = arith.addf %15, %16 : vector<6x16xf32>
    %18 = arith.negf %17 : vector<6x16xf32>
    %19 = math.exp %18 : vector<6x16xf32>
    %cst_16 = arith.constant 1.000000e+00 : f32
    %20 = vector.broadcast %cst_16 : f32 to vector<6x16xf32>
    %21 = arith.addf %20, %19 : vector<6x16xf32>
    %22 = arith.divf %20, %21 : vector<6x16xf32>
    %23 = vector.extract_strided_slice %13 {offsets = [0, 16], sizes = [6, 16], strides = [1, 1]} : vector<6x48xf32> to vector<6x16xf32>
    %24 = vector.extract_strided_slice %14 {offsets = [0, 16], sizes = [6, 16], strides = [1, 1]} : vector<6x48xf32> to vector<6x16xf32>
    %25 = arith.addf %23, %24 : vector<6x16xf32>
    %26 = arith.negf %25 : vector<6x16xf32>
    %27 = math.exp %26 : vector<6x16xf32>
    %cst_17 = arith.constant 1.000000e+00 : f32
    %28 = vector.broadcast %cst_17 : f32 to vector<6x16xf32>
    %29 = arith.addf %28, %27 : vector<6x16xf32>
    %30 = arith.divf %28, %29 : vector<6x16xf32>
    %31 = vector.extract_strided_slice %13 {offsets = [0, 32], sizes = [6, 16], strides = [1, 1]} : vector<6x48xf32> to vector<6x16xf32>
    %32 = vector.extract_strided_slice %14 {offsets = [0, 32], sizes = [6, 16], strides = [1, 1]} : vector<6x48xf32> to vector<6x16xf32>
    %33 = vector.broadcast %5 : vector<1x16xf32> to vector<6x16xf32>
    %34 = arith.addf %32, %33 : vector<6x16xf32>
    %35 = arith.mulf %22, %34 : vector<6x16xf32>
    %36 = arith.addf %31, %35 : vector<6x16xf32>
    %37 = math.tanh %36 : vector<6x16xf32>
    %cst_18 = arith.constant 1.000000e+00 : f32
    %38 = vector.broadcast %cst_18 : f32 to vector<6x16xf32>
    %39 = arith.subf %38, %30 : vector<6x16xf32>
    %40 = arith.mulf %39, %37 : vector<6x16xf32>
    %41 = arith.mulf %30, %9 : vector<6x16xf32>
    %42 = arith.addf %40, %41 : vector<6x16xf32>
    %43 = vector.broadcast %c0_i32 : i32 to vector<6x1xi32>
    %44 = arith.cmpi sgt, %8, %43 : vector<6x1xi32>
    %c7_i32 = arith.constant 7 : i32
    %45 = arith.subi %c7_i32, %c0_i32 : i32
    %46 = arith.index_cast %45 : i32 to index
    %c0_19 = arith.constant 0 : index
    %c0_20 = arith.constant 0 : index
    %47 = vector.load %arg2[%46, %c0_19, %c0_20] : memref<8x6x48xf32, #tpu.memory_space<vmem>>, vector<1x6x48xf32>
    %48 = vector.shape_cast %47 : vector<1x6x48xf32> to vector<6x48xf32>
    %cst_21 = arith.constant dense<0.000000e+00> : vector<6x48xf32>
    %49 = tpu.matmul %9, %3, %cst_21 {dimension_numbers = #tpu.dot_dimension_numbers<[1], [0], [0], [1], [0, 0, 1, 1], [], []>} : vector<6x16xf32>, vector<16x48xf32>, vector<6x48xf32> -> vector<6x48xf32>
    %50 = vector.extract_strided_slice %48 {offsets = [0, 0], sizes = [6, 16], strides = [1, 1]} : vector<6x48xf32> to vector<6x16xf32>
    %51 = vector.extract_strided_slice %49 {offsets = [0, 0], sizes = [6, 16], strides = [1, 1]} : vector<6x48xf32> to vector<6x16xf32>
    %52 = arith.addf %50, %51 : vector<6x16xf32>
    %53 = arith.negf %52 : vector<6x16xf32>
    %54 = math.exp %53 : vector<6x16xf32>
    %cst_22 = arith.constant 1.000000e+00 : f32
    %55 = vector.broadcast %cst_22 : f32 to vector<6x16xf32>
    %56 = arith.addf %55, %54 : vector<6x16xf32>
    %57 = arith.divf %55, %56 : vector<6x16xf32>
    %58 = vector.extract_strided_slice %48 {offsets = [0, 16], sizes = [6, 16], strides = [1, 1]} : vector<6x48xf32> to vector<6x16xf32>
    %59 = vector.extract_strided_slice %49 {offsets = [0, 16], sizes = [6, 16], strides = [1, 1]} : vector<6x48xf32> to vector<6x16xf32>
    %60 = arith.addf %58, %59 : vector<6x16xf32>
    %61 = arith.negf %60 : vector<6x16xf32>
    %62 = math.exp %61 : vector<6x16xf32>
    %cst_23 = arith.constant 1.000000e+00 : f32
    %63 = vector.broadcast %cst_23 : f32 to vector<6x16xf32>
    %64 = arith.addf %63, %62 : vector<6x16xf32>
    %65 = arith.divf %63, %64 : vector<6x16xf32>
    %66 = vector.extract_strided_slice %48 {offsets = [0, 32], sizes = [6, 16], strides = [1, 1]} : vector<6x48xf32> to vector<6x16xf32>
    %67 = vector.extract_strided_slice %49 {offsets = [0, 32], sizes = [6, 16], strides = [1, 1]} : vector<6x48xf32> to vector<6x16xf32>
    %68 = vector.broadcast %7 : vector<1x16xf32> to vector<6x16xf32>
    %69 = arith.addf %67, %68 : vector<6x16xf32>
    %70 = arith.mulf %57, %69 : vector<6x16xf32>
    %71 = arith.addf %66, %70 : vector<6x16xf32>
    %72 = math.tanh %71 : vector<6x16xf32>
    %cst_24 = arith.constant 1.000000e+00 : f32
    %73 = vector.broadcast %cst_24 : f32 to vector<6x16xf32>
    %74 = arith.subf %73, %65 : vector<6x16xf32>
    %75 = arith.mulf %74, %72 : vector<6x16xf32>
    %76 = arith.mulf %65, %9 : vector<6x16xf32>
    %77 = arith.addf %75, %76 : vector<6x16xf32>
    %c8_i32 = arith.constant 8 : i32
    %78 = vector.broadcast %c8_i32 : i32 to vector<6x1xi32>
    %79 = arith.subi %78, %8 : vector<6x1xi32>
    %80 = vector.broadcast %c0_i32 : i32 to vector<6x1xi32>
    %81 = arith.cmpi sge, %80, %79 : vector<6x1xi32>
    %82 = arith.maximumf %10, %42 : vector<6x16xf32>
    %83 = vector.shape_cast %44 : vector<6x1xi1> to vector<6x1xi1>
    %84 = vector.broadcast %83 : vector<6x1xi1> to vector<6x16xi1>
    %85 = arith.select %84, %82, %10 : vector<6x16xi1>, vector<6x16xf32>
    %86 = arith.maximumf %10, %77 : vector<6x16xf32>
    %87 = vector.shape_cast %81 : vector<6x1xi1> to vector<6x1xi1>
    %88 = vector.broadcast %87 : vector<6x1xi1> to vector<6x16xi1>
    %89 = arith.select %88, %86, %10 : vector<6x16xi1>, vector<6x16xf32>
    %c1_i32 = arith.constant 1 : i32
    %90 = arith.index_cast %c1_i32 : i32 to index
    %c0_25 = arith.constant 0 : index
    %c0_26 = arith.constant 0 : index
    %91 = vector.load %arg1[%90, %c0_25, %c0_26] : memref<8x6x48xf32, #tpu.memory_space<vmem>>, vector<1x6x48xf32>
    %92 = vector.shape_cast %91 : vector<1x6x48xf32> to vector<6x48xf32>
    %cst_27 = arith.constant dense<0.000000e+00> : vector<6x48xf32>
    %93 = tpu.matmul %42, %1, %cst_27 {dimension_numbers = #tpu.dot_dimension_numbers<[1], [0], [0], [1], [0, 0, 1, 1], [], []>} : vector<6x16xf32>, vector<16x48xf32>, vector<6x48xf32> -> vector<6x48xf32>
    %94 = vector.extract_strided_slice %92 {offsets = [0, 0], sizes = [6, 16], strides = [1, 1]} : vector<6x48xf32> to vector<6x16xf32>
    %95 = vector.extract_strided_slice %93 {offsets = [0, 0], sizes = [6, 16], strides = [1, 1]} : vector<6x48xf32> to vector<6x16xf32>
    %96 = arith.addf %94, %95 : vector<6x16xf32>
    %97 = arith.negf %96 : vector<6x16xf32>
    %98 = math.exp %97 : vector<6x16xf32>
    %cst_28 = arith.constant 1.000000e+00 : f32
    %99 = vector.broadcast %cst_28 : f32 to vector<6x16xf32>
    %100 = arith.addf %99, %98 : vector<6x16xf32>
    %101 = arith.divf %99, %100 : vector<6x16xf32>
    %102 = vector.extract_strided_slice %92 {offsets = [0, 16], sizes = [6, 16], strides = [1, 1]} : vector<6x48xf32> to vector<6x16xf32>
    %103 = vector.extract_strided_slice %93 {offsets = [0, 16], sizes = [6, 16], strides = [1, 1]} : vector<6x48xf32> to vector<6x16xf32>
    %104 = arith.addf %102, %103 : vector<6x16xf32>
    %105 = arith.negf %104 : vector<6x16xf32>
    %106 = math.exp %105 : vector<6x16xf32>
    %cst_29 = arith.constant 1.000000e+00 : f32
    %107 = vector.broadcast %cst_29 : f32 to vector<6x16xf32>
    %108 = arith.addf %107, %106 : vector<6x16xf32>
    %109 = arith.divf %107, %108 : vector<6x16xf32>
    %110 = vector.extract_strided_slice %92 {offsets = [0, 32], sizes = [6, 16], strides = [1, 1]} : vector<6x48xf32> to vector<6x16xf32>
    %111 = vector.extract_strided_slice %93 {offsets = [0, 32], sizes = [6, 16], strides = [1, 1]} : vector<6x48xf32> to vector<6x16xf32>
    %112 = vector.broadcast %5 : vector<1x16xf32> to vector<6x16xf32>
    %113 = arith.addf %111, %112 : vector<6x16xf32>
    %114 = arith.mulf %101, %113 : vector<6x16xf32>
    %115 = arith.addf %110, %114 : vector<6x16xf32>
    %116 = math.tanh %115 : vector<6x16xf32>
    %cst_30 = arith.constant 1.000000e+00 : f32
    %117 = vector.broadcast %cst_30 : f32 to vector<6x16xf32>
    %118 = arith.subf %117, %109 : vector<6x16xf32>
    %119 = arith.mulf %118, %116 : vector<6x16xf32>
    %120 = arith.mulf %109, %42 : vector<6x16xf32>
    %121 = arith.addf %119, %120 : vector<6x16xf32>
    %122 = vector.broadcast %c1_i32 : i32 to vector<6x1xi32>
    %123 = arith.cmpi sgt, %8, %122 : vector<6x1xi32>
    %c7_i32_31 = arith.constant 7 : i32
    %124 = arith.subi %c7_i32_31, %c1_i32 : i32
    %125 = arith.index_cast %124 : i32 to index
    %c0_32 = arith.constant 0 : index
    %c0_33 = arith.constant 0 : index
    %126 = vector.load %arg2[%125, %c0_32, %c0_33] : memref<8x6x48xf32, #tpu.memory_space<vmem>>, vector<1x6x48xf32>
    %127 = vector.shape_cast %126 : vector<1x6x48xf32> to vector<6x48xf32>
    %cst_34 = arith.constant dense<0.000000e+00> : vector<6x48xf32>
    %128 = tpu.matmul %77, %3, %cst_34 {dimension_numbers = #tpu.dot_dimension_numbers<[1], [0], [0], [1], [0, 0, 1, 1], [], []>} : vector<6x16xf32>, vector<16x48xf32>, vector<6x48xf32> -> vector<6x48xf32>
    %129 = vector.extract_strided_slice %127 {offsets = [0, 0], sizes = [6, 16], strides = [1, 1]} : vector<6x48xf32> to vector<6x16xf32>
    %130 = vector.extract_strided_slice %128 {offsets = [0, 0], sizes = [6, 16], strides = [1, 1]} : vector<6x48xf32> to vector<6x16xf32>
    %131 = arith.addf %129, %130 : vector<6x16xf32>
    %132 = arith.negf %131 : vector<6x16xf32>
    %133 = math.exp %132 : vector<6x16xf32>
    %cst_35 = arith.constant 1.000000e+00 : f32
    %134 = vector.broadcast %cst_35 : f32 to vector<6x16xf32>
    %135 = arith.addf %134, %133 : vector<6x16xf32>
    %136 = arith.divf %134, %135 : vector<6x16xf32>
    %137 = vector.extract_strided_slice %127 {offsets = [0, 16], sizes = [6, 16], strides = [1, 1]} : vector<6x48xf32> to vector<6x16xf32>
    %138 = vector.extract_strided_slice %128 {offsets = [0, 16], sizes = [6, 16], strides = [1, 1]} : vector<6x48xf32> to vector<6x16xf32>
    %139 = arith.addf %137, %138 : vector<6x16xf32>
    %140 = arith.negf %139 : vector<6x16xf32>
    %141 = math.exp %140 : vector<6x16xf32>
    %cst_36 = arith.constant 1.000000e+00 : f32
    %142 = vector.broadcast %cst_36 : f32 to vector<6x16xf32>
    %143 = arith.addf %142, %141 : vector<6x16xf32>
    %144 = arith.divf %142, %143 : vector<6x16xf32>
    %145 = vector.extract_strided_slice %127 {offsets = [0, 32], sizes = [6, 16], strides = [1, 1]} : vector<6x48xf32> to vector<6x16xf32>
    %146 = vector.extract_strided_slice %128 {offsets = [0, 32], sizes = [6, 16], strides = [1, 1]} : vector<6x48xf32> to vector<6x16xf32>
    %147 = vector.broadcast %7 : vector<1x16xf32> to vector<6x16xf32>
    %148 = arith.addf %146, %147 : vector<6x16xf32>
    %149 = arith.mulf %136, %148 : vector<6x16xf32>
    %150 = arith.addf %145, %149 : vector<6x16xf32>
    %151 = math.tanh %150 : vector<6x16xf32>
    %cst_37 = arith.constant 1.000000e+00 : f32
    %152 = vector.broadcast %cst_37 : f32 to vector<6x16xf32>
    %153 = arith.subf %152, %144 : vector<6x16xf32>
    %154 = arith.mulf %153, %151 : vector<6x16xf32>
    %155 = arith.mulf %144, %77 : vector<6x16xf32>
    %156 = arith.addf %154, %155 : vector<6x16xf32>
    %c8_i32_38 = arith.constant 8 : i32
    %157 = vector.broadcast %c8_i32_38 : i32 to vector<6x1xi32>
    %158 = arith.subi %157, %8 : vector<6x1xi32>
    %159 = vector.broadcast %c1_i32 : i32 to vector<6x1xi32>
    %160 = arith.cmpi sge, %159, %158 : vector<6x1xi32>
    %161 = arith.maximumf %85, %121 : vector<6x16xf32>
    %162 = vector.shape_cast %123 : vector<6x1xi1> to vector<6x1xi1>
    %163 = vector.broadcast %162 : vector<6x1xi1> to vector<6x16xi1>
    %164 = arith.select %163, %161, %85 : vector<6x16xi1>, vector<6x16xf32>
    %165 = arith.maximumf %89, %156 : vector<6x16xf32>
    %166 = vector.shape_cast %160 : vector<6x1xi1> to vector<6x1xi1>
    %167 = vector.broadcast %166 : vector<6x1xi1> to vector<6x16xi1>
    %168 = arith.select %167, %165, %89 : vector<6x16xi1>, vector<6x16xf32>
    %c2_i32 = arith.constant 2 : i32
    %169 = arith.index_cast %c2_i32 : i32 to index
    %c0_39 = arith.constant 0 : index
    %c0_40 = arith.constant 0 : index
    %170 = vector.load %arg1[%169, %c0_39, %c0_40] : memref<8x6x48xf32, #tpu.memory_space<vmem>>, vector<1x6x48xf32>
    %171 = vector.shape_cast %170 : vector<1x6x48xf32> to vector<6x48xf32>
    %cst_41 = arith.constant dense<0.000000e+00> : vector<6x48xf32>
    %172 = tpu.matmul %121, %1, %cst_41 {dimension_numbers = #tpu.dot_dimension_numbers<[1], [0], [0], [1], [0, 0, 1, 1], [], []>} : vector<6x16xf32>, vector<16x48xf32>, vector<6x48xf32> -> vector<6x48xf32>
    %173 = vector.extract_strided_slice %171 {offsets = [0, 0], sizes = [6, 16], strides = [1, 1]} : vector<6x48xf32> to vector<6x16xf32>
    %174 = vector.extract_strided_slice %172 {offsets = [0, 0], sizes = [6, 16], strides = [1, 1]} : vector<6x48xf32> to vector<6x16xf32>
    %175 = arith.addf %173, %174 : vector<6x16xf32>
    %176 = arith.negf %175 : vector<6x16xf32>
    %177 = math.exp %176 : vector<6x16xf32>
    %cst_42 = arith.constant 1.000000e+00 : f32
    %178 = vector.broadcast %cst_42 : f32 to vector<6x16xf32>
    %179 = arith.addf %178, %177 : vector<6x16xf32>
    %180 = arith.divf %178, %179 : vector<6x16xf32>
    %181 = vector.extract_strided_slice %171 {offsets = [0, 16], sizes = [6, 16], strides = [1, 1]} : vector<6x48xf32> to vector<6x16xf32>
    %182 = vector.extract_strided_slice %172 {offsets = [0, 16], sizes = [6, 16], strides = [1, 1]} : vector<6x48xf32> to vector<6x16xf32>
    %183 = arith.addf %181, %182 : vector<6x16xf32>
    %184 = arith.negf %183 : vector<6x16xf32>
    %185 = math.exp %184 : vector<6x16xf32>
    %cst_43 = arith.constant 1.000000e+00 : f32
    %186 = vector.broadcast %cst_43 : f32 to vector<6x16xf32>
    %187 = arith.addf %186, %185 : vector<6x16xf32>
    %188 = arith.divf %186, %187 : vector<6x16xf32>
    %189 = vector.extract_strided_slice %171 {offsets = [0, 32], sizes = [6, 16], strides = [1, 1]} : vector<6x48xf32> to vector<6x16xf32>
    %190 = vector.extract_strided_slice %172 {offsets = [0, 32], sizes = [6, 16], strides = [1, 1]} : vector<6x48xf32> to vector<6x16xf32>
    %191 = vector.broadcast %5 : vector<1x16xf32> to vector<6x16xf32>
    %192 = arith.addf %190, %191 : vector<6x16xf32>
    %193 = arith.mulf %180, %192 : vector<6x16xf32>
    %194 = arith.addf %189, %193 : vector<6x16xf32>
    %195 = math.tanh %194 : vector<6x16xf32>
    %cst_44 = arith.constant 1.000000e+00 : f32
    %196 = vector.broadcast %cst_44 : f32 to vector<6x16xf32>
    %197 = arith.subf %196, %188 : vector<6x16xf32>
    %198 = arith.mulf %197, %195 : vector<6x16xf32>
    %199 = arith.mulf %188, %121 : vector<6x16xf32>
    %200 = arith.addf %198, %199 : vector<6x16xf32>
    %201 = vector.broadcast %c2_i32 : i32 to vector<6x1xi32>
    %202 = arith.cmpi sgt, %8, %201 : vector<6x1xi32>
    %c7_i32_45 = arith.constant 7 : i32
    %203 = arith.subi %c7_i32_45, %c2_i32 : i32
    %204 = arith.index_cast %203 : i32 to index
    %c0_46 = arith.constant 0 : index
    %c0_47 = arith.constant 0 : index
    %205 = vector.load %arg2[%204, %c0_46, %c0_47] : memref<8x6x48xf32, #tpu.memory_space<vmem>>, vector<1x6x48xf32>
    %206 = vector.shape_cast %205 : vector<1x6x48xf32> to vector<6x48xf32>
    %cst_48 = arith.constant dense<0.000000e+00> : vector<6x48xf32>
    %207 = tpu.matmul %156, %3, %cst_48 {dimension_numbers = #tpu.dot_dimension_numbers<[1], [0], [0], [1], [0, 0, 1, 1], [], []>} : vector<6x16xf32>, vector<16x48xf32>, vector<6x48xf32> -> vector<6x48xf32>
    %208 = vector.extract_strided_slice %206 {offsets = [0, 0], sizes = [6, 16], strides = [1, 1]} : vector<6x48xf32> to vector<6x16xf32>
    %209 = vector.extract_strided_slice %207 {offsets = [0, 0], sizes = [6, 16], strides = [1, 1]} : vector<6x48xf32> to vector<6x16xf32>
    %210 = arith.addf %208, %209 : vector<6x16xf32>
    %211 = arith.negf %210 : vector<6x16xf32>
    %212 = math.exp %211 : vector<6x16xf32>
    %cst_49 = arith.constant 1.000000e+00 : f32
    %213 = vector.broadcast %cst_49 : f32 to vector<6x16xf32>
    %214 = arith.addf %213, %212 : vector<6x16xf32>
    %215 = arith.divf %213, %214 : vector<6x16xf32>
    %216 = vector.extract_strided_slice %206 {offsets = [0, 16], sizes = [6, 16], strides = [1, 1]} : vector<6x48xf32> to vector<6x16xf32>
    %217 = vector.extract_strided_slice %207 {offsets = [0, 16], sizes = [6, 16], strides = [1, 1]} : vector<6x48xf32> to vector<6x16xf32>
    %218 = arith.addf %216, %217 : vector<6x16xf32>
    %219 = arith.negf %218 : vector<6x16xf32>
    %220 = math.exp %219 : vector<6x16xf32>
    %cst_50 = arith.constant 1.000000e+00 : f32
    %221 = vector.broadcast %cst_50 : f32 to vector<6x16xf32>
    %222 = arith.addf %221, %220 : vector<6x16xf32>
    %223 = arith.divf %221, %222 : vector<6x16xf32>
    %224 = vector.extract_strided_slice %206 {offsets = [0, 32], sizes = [6, 16], strides = [1, 1]} : vector<6x48xf32> to vector<6x16xf32>
    %225 = vector.extract_strided_slice %207 {offsets = [0, 32], sizes = [6, 16], strides = [1, 1]} : vector<6x48xf32> to vector<6x16xf32>
    %226 = vector.broadcast %7 : vector<1x16xf32> to vector<6x16xf32>
    %227 = arith.addf %225, %226 : vector<6x16xf32>
    %228 = arith.mulf %215, %227 : vector<6x16xf32>
    %229 = arith.addf %224, %228 : vector<6x16xf32>
    %230 = math.tanh %229 : vector<6x16xf32>
    %cst_51 = arith.constant 1.000000e+00 : f32
    %231 = vector.broadcast %cst_51 : f32 to vector<6x16xf32>
    %232 = arith.subf %231, %223 : vector<6x16xf32>
    %233 = arith.mulf %232, %230 : vector<6x16xf32>
    %234 = arith.mulf %223, %156 : vector<6x16xf32>
    %235 = arith.addf %233, %234 : vector<6x16xf32>
    %c8_i32_52 = arith.constant 8 : i32
    %236 = vector.broadcast %c8_i32_52 : i32 to vector<6x1xi32>
    %237 = arith.subi %236, %8 : vector<6x1xi32>
    %238 = vector.broadcast %c2_i32 : i32 to vector<6x1xi32>
    %239 = arith.cmpi sge, %238, %237 : vector<6x1xi32>
    %240 = arith.maximumf %164, %200 : vector<6x16xf32>
    %241 = vector.shape_cast %202 : vector<6x1xi1> to vector<6x1xi1>
    %242 = vector.broadcast %241 : vector<6x1xi1> to vector<6x16xi1>
    %243 = arith.select %242, %240, %164 : vector<6x16xi1>, vector<6x16xf32>
    %244 = arith.maximumf %168, %235 : vector<6x16xf32>
    %245 = vector.shape_cast %239 : vector<6x1xi1> to vector<6x1xi1>
    %246 = vector.broadcast %245 : vector<6x1xi1> to vector<6x16xi1>
    %247 = arith.select %246, %244, %168 : vector<6x16xi1>, vector<6x16xf32>
    %c3_i32 = arith.constant 3 : i32
    %248 = arith.index_cast %c3_i32 : i32 to index
    %c0_53 = arith.constant 0 : index
    %c0_54 = arith.constant 0 : index
    %249 = vector.load %arg1[%248, %c0_53, %c0_54] : memref<8x6x48xf32, #tpu.memory_space<vmem>>, vector<1x6x48xf32>
    %250 = vector.shape_cast %249 : vector<1x6x48xf32> to vector<6x48xf32>
    %cst_55 = arith.constant dense<0.000000e+00> : vector<6x48xf32>
    %251 = tpu.matmul %200, %1, %cst_55 {dimension_numbers = #tpu.dot_dimension_numbers<[1], [0], [0], [1], [0, 0, 1, 1], [], []>} : vector<6x16xf32>, vector<16x48xf32>, vector<6x48xf32> -> vector<6x48xf32>
    %252 = vector.extract_strided_slice %250 {offsets = [0, 0], sizes = [6, 16], strides = [1, 1]} : vector<6x48xf32> to vector<6x16xf32>
    %253 = vector.extract_strided_slice %251 {offsets = [0, 0], sizes = [6, 16], strides = [1, 1]} : vector<6x48xf32> to vector<6x16xf32>
    %254 = arith.addf %252, %253 : vector<6x16xf32>
    %255 = arith.negf %254 : vector<6x16xf32>
    %256 = math.exp %255 : vector<6x16xf32>
    %cst_56 = arith.constant 1.000000e+00 : f32
    %257 = vector.broadcast %cst_56 : f32 to vector<6x16xf32>
    %258 = arith.addf %257, %256 : vector<6x16xf32>
    %259 = arith.divf %257, %258 : vector<6x16xf32>
    %260 = vector.extract_strided_slice %250 {offsets = [0, 16], sizes = [6, 16], strides = [1, 1]} : vector<6x48xf32> to vector<6x16xf32>
    %261 = vector.extract_strided_slice %251 {offsets = [0, 16], sizes = [6, 16], strides = [1, 1]} : vector<6x48xf32> to vector<6x16xf32>
    %262 = arith.addf %260, %261 : vector<6x16xf32>
    %263 = arith.negf %262 : vector<6x16xf32>
    %264 = math.exp %263 : vector<6x16xf32>
    %cst_57 = arith.constant 1.000000e+00 : f32
    %265 = vector.broadcast %cst_57 : f32 to vector<6x16xf32>
    %266 = arith.addf %265, %264 : vector<6x16xf32>
    %267 = arith.divf %265, %266 : vector<6x16xf32>
    %268 = vector.extract_strided_slice %250 {offsets = [0, 32], sizes = [6, 16], strides = [1, 1]} : vector<6x48xf32> to vector<6x16xf32>
    %269 = vector.extract_strided_slice %251 {offsets = [0, 32], sizes = [6, 16], strides = [1, 1]} : vector<6x48xf32> to vector<6x16xf32>
    %270 = vector.broadcast %5 : vector<1x16xf32> to vector<6x16xf32>
    %271 = arith.addf %269, %270 : vector<6x16xf32>
    %272 = arith.mulf %259, %271 : vector<6x16xf32>
    %273 = arith.addf %268, %272 : vector<6x16xf32>
    %274 = math.tanh %273 : vector<6x16xf32>
    %cst_58 = arith.constant 1.000000e+00 : f32
    %275 = vector.broadcast %cst_58 : f32 to vector<6x16xf32>
    %276 = arith.subf %275, %267 : vector<6x16xf32>
    %277 = arith.mulf %276, %274 : vector<6x16xf32>
    %278 = arith.mulf %267, %200 : vector<6x16xf32>
    %279 = arith.addf %277, %278 : vector<6x16xf32>
    %280 = vector.broadcast %c3_i32 : i32 to vector<6x1xi32>
    %281 = arith.cmpi sgt, %8, %280 : vector<6x1xi32>
    %c7_i32_59 = arith.constant 7 : i32
    %282 = arith.subi %c7_i32_59, %c3_i32 : i32
    %283 = arith.index_cast %282 : i32 to index
    %c0_60 = arith.constant 0 : index
    %c0_61 = arith.constant 0 : index
    %284 = vector.load %arg2[%283, %c0_60, %c0_61] : memref<8x6x48xf32, #tpu.memory_space<vmem>>, vector<1x6x48xf32>
    %285 = vector.shape_cast %284 : vector<1x6x48xf32> to vector<6x48xf32>
    %cst_62 = arith.constant dense<0.000000e+00> : vector<6x48xf32>
    %286 = tpu.matmul %235, %3, %cst_62 {dimension_numbers = #tpu.dot_dimension_numbers<[1], [0], [0], [1], [0, 0, 1, 1], [], []>} : vector<6x16xf32>, vector<16x48xf32>, vector<6x48xf32> -> vector<6x48xf32>
    %287 = vector.extract_strided_slice %285 {offsets = [0, 0], sizes = [6, 16], strides = [1, 1]} : vector<6x48xf32> to vector<6x16xf32>
    %288 = vector.extract_strided_slice %286 {offsets = [0, 0], sizes = [6, 16], strides = [1, 1]} : vector<6x48xf32> to vector<6x16xf32>
    %289 = arith.addf %287, %288 : vector<6x16xf32>
    %290 = arith.negf %289 : vector<6x16xf32>
    %291 = math.exp %290 : vector<6x16xf32>
    %cst_63 = arith.constant 1.000000e+00 : f32
    %292 = vector.broadcast %cst_63 : f32 to vector<6x16xf32>
    %293 = arith.addf %292, %291 : vector<6x16xf32>
    %294 = arith.divf %292, %293 : vector<6x16xf32>
    %295 = vector.extract_strided_slice %285 {offsets = [0, 16], sizes = [6, 16], strides = [1, 1]} : vector<6x48xf32> to vector<6x16xf32>
    %296 = vector.extract_strided_slice %286 {offsets = [0, 16], sizes = [6, 16], strides = [1, 1]} : vector<6x48xf32> to vector<6x16xf32>
    %297 = arith.addf %295, %296 : vector<6x16xf32>
    %298 = arith.negf %297 : vector<6x16xf32>
    %299 = math.exp %298 : vector<6x16xf32>
    %cst_64 = arith.constant 1.000000e+00 : f32
    %300 = vector.broadcast %cst_64 : f32 to vector<6x16xf32>
    %301 = arith.addf %300, %299 : vector<6x16xf32>
    %302 = arith.divf %300, %301 : vector<6x16xf32>
    %303 = vector.extract_strided_slice %285 {offsets = [0, 32], sizes = [6, 16], strides = [1, 1]} : vector<6x48xf32> to vector<6x16xf32>
    %304 = vector.extract_strided_slice %286 {offsets = [0, 32], sizes = [6, 16], strides = [1, 1]} : vector<6x48xf32> to vector<6x16xf32>
    %305 = vector.broadcast %7 : vector<1x16xf32> to vector<6x16xf32>
    %306 = arith.addf %304, %305 : vector<6x16xf32>
    %307 = arith.mulf %294, %306 : vector<6x16xf32>
    %308 = arith.addf %303, %307 : vector<6x16xf32>
    %309 = math.tanh %308 : vector<6x16xf32>
    %cst_65 = arith.constant 1.000000e+00 : f32
    %310 = vector.broadcast %cst_65 : f32 to vector<6x16xf32>
    %311 = arith.subf %310, %302 : vector<6x16xf32>
    %312 = arith.mulf %311, %309 : vector<6x16xf32>
    %313 = arith.mulf %302, %235 : vector<6x16xf32>
    %314 = arith.addf %312, %313 : vector<6x16xf32>
    %c8_i32_66 = arith.constant 8 : i32
    %315 = vector.broadcast %c8_i32_66 : i32 to vector<6x1xi32>
    %316 = arith.subi %315, %8 : vector<6x1xi32>
    %317 = vector.broadcast %c3_i32 : i32 to vector<6x1xi32>
    %318 = arith.cmpi sge, %317, %316 : vector<6x1xi32>
    %319 = arith.maximumf %243, %279 : vector<6x16xf32>
    %320 = vector.shape_cast %281 : vector<6x1xi1> to vector<6x1xi1>
    %321 = vector.broadcast %320 : vector<6x1xi1> to vector<6x16xi1>
    %322 = arith.select %321, %319, %243 : vector<6x16xi1>, vector<6x16xf32>
    %323 = arith.maximumf %247, %314 : vector<6x16xf32>
    %324 = vector.shape_cast %318 : vector<6x1xi1> to vector<6x1xi1>
    %325 = vector.broadcast %324 : vector<6x1xi1> to vector<6x16xi1>
    %326 = arith.select %325, %323, %247 : vector<6x16xi1>, vector<6x16xf32>
    %c4_i32 = arith.constant 4 : i32
    %327 = arith.index_cast %c4_i32 : i32 to index
    %c0_67 = arith.constant 0 : index
    %c0_68 = arith.constant 0 : index
    %328 = vector.load %arg1[%327, %c0_67, %c0_68] : memref<8x6x48xf32, #tpu.memory_space<vmem>>, vector<1x6x48xf32>
    %329 = vector.shape_cast %328 : vector<1x6x48xf32> to vector<6x48xf32>
    %cst_69 = arith.constant dense<0.000000e+00> : vector<6x48xf32>
    %330 = tpu.matmul %279, %1, %cst_69 {dimension_numbers = #tpu.dot_dimension_numbers<[1], [0], [0], [1], [0, 0, 1, 1], [], []>} : vector<6x16xf32>, vector<16x48xf32>, vector<6x48xf32> -> vector<6x48xf32>
    %331 = vector.extract_strided_slice %329 {offsets = [0, 0], sizes = [6, 16], strides = [1, 1]} : vector<6x48xf32> to vector<6x16xf32>
    %332 = vector.extract_strided_slice %330 {offsets = [0, 0], sizes = [6, 16], strides = [1, 1]} : vector<6x48xf32> to vector<6x16xf32>
    %333 = arith.addf %331, %332 : vector<6x16xf32>
    %334 = arith.negf %333 : vector<6x16xf32>
    %335 = math.exp %334 : vector<6x16xf32>
    %cst_70 = arith.constant 1.000000e+00 : f32
    %336 = vector.broadcast %cst_70 : f32 to vector<6x16xf32>
    %337 = arith.addf %336, %335 : vector<6x16xf32>
    %338 = arith.divf %336, %337 : vector<6x16xf32>
    %339 = vector.extract_strided_slice %329 {offsets = [0, 16], sizes = [6, 16], strides = [1, 1]} : vector<6x48xf32> to vector<6x16xf32>
    %340 = vector.extract_strided_slice %330 {offsets = [0, 16], sizes = [6, 16], strides = [1, 1]} : vector<6x48xf32> to vector<6x16xf32>
    %341 = arith.addf %339, %340 : vector<6x16xf32>
    %342 = arith.negf %341 : vector<6x16xf32>
    %343 = math.exp %342 : vector<6x16xf32>
    %cst_71 = arith.constant 1.000000e+00 : f32
    %344 = vector.broadcast %cst_71 : f32 to vector<6x16xf32>
    %345 = arith.addf %344, %343 : vector<6x16xf32>
    %346 = arith.divf %344, %345 : vector<6x16xf32>
    %347 = vector.extract_strided_slice %329 {offsets = [0, 32], sizes = [6, 16], strides = [1, 1]} : vector<6x48xf32> to vector<6x16xf32>
    %348 = vector.extract_strided_slice %330 {offsets = [0, 32], sizes = [6, 16], strides = [1, 1]} : vector<6x48xf32> to vector<6x16xf32>
    %349 = vector.broadcast %5 : vector<1x16xf32> to vector<6x16xf32>
    %350 = arith.addf %348, %349 : vector<6x16xf32>
    %351 = arith.mulf %338, %350 : vector<6x16xf32>
    %352 = arith.addf %347, %351 : vector<6x16xf32>
    %353 = math.tanh %352 : vector<6x16xf32>
    %cst_72 = arith.constant 1.000000e+00 : f32
    %354 = vector.broadcast %cst_72 : f32 to vector<6x16xf32>
    %355 = arith.subf %354, %346 : vector<6x16xf32>
    %356 = arith.mulf %355, %353 : vector<6x16xf32>
    %357 = arith.mulf %346, %279 : vector<6x16xf32>
    %358 = arith.addf %356, %357 : vector<6x16xf32>
    %359 = vector.broadcast %c4_i32 : i32 to vector<6x1xi32>
    %360 = arith.cmpi sgt, %8, %359 : vector<6x1xi32>
    %c7_i32_73 = arith.constant 7 : i32
    %361 = arith.subi %c7_i32_73, %c4_i32 : i32
    %362 = arith.index_cast %361 : i32 to index
    %c0_74 = arith.constant 0 : index
    %c0_75 = arith.constant 0 : index
    %363 = vector.load %arg2[%362, %c0_74, %c0_75] : memref<8x6x48xf32, #tpu.memory_space<vmem>>, vector<1x6x48xf32>
    %364 = vector.shape_cast %363 : vector<1x6x48xf32> to vector<6x48xf32>
    %cst_76 = arith.constant dense<0.000000e+00> : vector<6x48xf32>
    %365 = tpu.matmul %314, %3, %cst_76 {dimension_numbers = #tpu.dot_dimension_numbers<[1], [0], [0], [1], [0, 0, 1, 1], [], []>} : vector<6x16xf32>, vector<16x48xf32>, vector<6x48xf32> -> vector<6x48xf32>
    %366 = vector.extract_strided_slice %364 {offsets = [0, 0], sizes = [6, 16], strides = [1, 1]} : vector<6x48xf32> to vector<6x16xf32>
    %367 = vector.extract_strided_slice %365 {offsets = [0, 0], sizes = [6, 16], strides = [1, 1]} : vector<6x48xf32> to vector<6x16xf32>
    %368 = arith.addf %366, %367 : vector<6x16xf32>
    %369 = arith.negf %368 : vector<6x16xf32>
    %370 = math.exp %369 : vector<6x16xf32>
    %cst_77 = arith.constant 1.000000e+00 : f32
    %371 = vector.broadcast %cst_77 : f32 to vector<6x16xf32>
    %372 = arith.addf %371, %370 : vector<6x16xf32>
    %373 = arith.divf %371, %372 : vector<6x16xf32>
    %374 = vector.extract_strided_slice %364 {offsets = [0, 16], sizes = [6, 16], strides = [1, 1]} : vector<6x48xf32> to vector<6x16xf32>
    %375 = vector.extract_strided_slice %365 {offsets = [0, 16], sizes = [6, 16], strides = [1, 1]} : vector<6x48xf32> to vector<6x16xf32>
    %376 = arith.addf %374, %375 : vector<6x16xf32>
    %377 = arith.negf %376 : vector<6x16xf32>
    %378 = math.exp %377 : vector<6x16xf32>
    %cst_78 = arith.constant 1.000000e+00 : f32
    %379 = vector.broadcast %cst_78 : f32 to vector<6x16xf32>
    %380 = arith.addf %379, %378 : vector<6x16xf32>
    %381 = arith.divf %379, %380 : vector<6x16xf32>
    %382 = vector.extract_strided_slice %364 {offsets = [0, 32], sizes = [6, 16], strides = [1, 1]} : vector<6x48xf32> to vector<6x16xf32>
    %383 = vector.extract_strided_slice %365 {offsets = [0, 32], sizes = [6, 16], strides = [1, 1]} : vector<6x48xf32> to vector<6x16xf32>
    %384 = vector.broadcast %7 : vector<1x16xf32> to vector<6x16xf32>
    %385 = arith.addf %383, %384 : vector<6x16xf32>
    %386 = arith.mulf %373, %385 : vector<6x16xf32>
    %387 = arith.addf %382, %386 : vector<6x16xf32>
    %388 = math.tanh %387 : vector<6x16xf32>
    %cst_79 = arith.constant 1.000000e+00 : f32
    %389 = vector.broadcast %cst_79 : f32 to vector<6x16xf32>
    %390 = arith.subf %389, %381 : vector<6x16xf32>
    %391 = arith.mulf %390, %388 : vector<6x16xf32>
    %392 = arith.mulf %381, %314 : vector<6x16xf32>
    %393 = arith.addf %391, %392 : vector<6x16xf32>
    %c8_i32_80 = arith.constant 8 : i32
    %394 = vector.broadcast %c8_i32_80 : i32 to vector<6x1xi32>
    %395 = arith.subi %394, %8 : vector<6x1xi32>
    %396 = vector.broadcast %c4_i32 : i32 to vector<6x1xi32>
    %397 = arith.cmpi sge, %396, %395 : vector<6x1xi32>
    %398 = arith.maximumf %322, %358 : vector<6x16xf32>
    %399 = vector.shape_cast %360 : vector<6x1xi1> to vector<6x1xi1>
    %400 = vector.broadcast %399 : vector<6x1xi1> to vector<6x16xi1>
    %401 = arith.select %400, %398, %322 : vector<6x16xi1>, vector<6x16xf32>
    %402 = arith.maximumf %326, %393 : vector<6x16xf32>
    %403 = vector.shape_cast %397 : vector<6x1xi1> to vector<6x1xi1>
    %404 = vector.broadcast %403 : vector<6x1xi1> to vector<6x16xi1>
    %405 = arith.select %404, %402, %326 : vector<6x16xi1>, vector<6x16xf32>
    %c5_i32 = arith.constant 5 : i32
    %406 = arith.index_cast %c5_i32 : i32 to index
    %c0_81 = arith.constant 0 : index
    %c0_82 = arith.constant 0 : index
    %407 = vector.load %arg1[%406, %c0_81, %c0_82] : memref<8x6x48xf32, #tpu.memory_space<vmem>>, vector<1x6x48xf32>
    %408 = vector.shape_cast %407 : vector<1x6x48xf32> to vector<6x48xf32>
    %cst_83 = arith.constant dense<0.000000e+00> : vector<6x48xf32>
    %409 = tpu.matmul %358, %1, %cst_83 {dimension_numbers = #tpu.dot_dimension_numbers<[1], [0], [0], [1], [0, 0, 1, 1], [], []>} : vector<6x16xf32>, vector<16x48xf32>, vector<6x48xf32> -> vector<6x48xf32>
    %410 = vector.extract_strided_slice %408 {offsets = [0, 0], sizes = [6, 16], strides = [1, 1]} : vector<6x48xf32> to vector<6x16xf32>
    %411 = vector.extract_strided_slice %409 {offsets = [0, 0], sizes = [6, 16], strides = [1, 1]} : vector<6x48xf32> to vector<6x16xf32>
    %412 = arith.addf %410, %411 : vector<6x16xf32>
    %413 = arith.negf %412 : vector<6x16xf32>
    %414 = math.exp %413 : vector<6x16xf32>
    %cst_84 = arith.constant 1.000000e+00 : f32
    %415 = vector.broadcast %cst_84 : f32 to vector<6x16xf32>
    %416 = arith.addf %415, %414 : vector<6x16xf32>
    %417 = arith.divf %415, %416 : vector<6x16xf32>
    %418 = vector.extract_strided_slice %408 {offsets = [0, 16], sizes = [6, 16], strides = [1, 1]} : vector<6x48xf32> to vector<6x16xf32>
    %419 = vector.extract_strided_slice %409 {offsets = [0, 16], sizes = [6, 16], strides = [1, 1]} : vector<6x48xf32> to vector<6x16xf32>
    %420 = arith.addf %418, %419 : vector<6x16xf32>
    %421 = arith.negf %420 : vector<6x16xf32>
    %422 = math.exp %421 : vector<6x16xf32>
    %cst_85 = arith.constant 1.000000e+00 : f32
    %423 = vector.broadcast %cst_85 : f32 to vector<6x16xf32>
    %424 = arith.addf %423, %422 : vector<6x16xf32>
    %425 = arith.divf %423, %424 : vector<6x16xf32>
    %426 = vector.extract_strided_slice %408 {offsets = [0, 32], sizes = [6, 16], strides = [1, 1]} : vector<6x48xf32> to vector<6x16xf32>
    %427 = vector.extract_strided_slice %409 {offsets = [0, 32], sizes = [6, 16], strides = [1, 1]} : vector<6x48xf32> to vector<6x16xf32>
    %428 = vector.broadcast %5 : vector<1x16xf32> to vector<6x16xf32>
    %429 = arith.addf %427, %428 : vector<6x16xf32>
    %430 = arith.mulf %417, %429 : vector<6x16xf32>
    %431 = arith.addf %426, %430 : vector<6x16xf32>
    %432 = math.tanh %431 : vector<6x16xf32>
    %cst_86 = arith.constant 1.000000e+00 : f32
    %433 = vector.broadcast %cst_86 : f32 to vector<6x16xf32>
    %434 = arith.subf %433, %425 : vector<6x16xf32>
    %435 = arith.mulf %434, %432 : vector<6x16xf32>
    %436 = arith.mulf %425, %358 : vector<6x16xf32>
    %437 = arith.addf %435, %436 : vector<6x16xf32>
    %438 = vector.broadcast %c5_i32 : i32 to vector<6x1xi32>
    %439 = arith.cmpi sgt, %8, %438 : vector<6x1xi32>
    %c7_i32_87 = arith.constant 7 : i32
    %440 = arith.subi %c7_i32_87, %c5_i32 : i32
    %441 = arith.index_cast %440 : i32 to index
    %c0_88 = arith.constant 0 : index
    %c0_89 = arith.constant 0 : index
    %442 = vector.load %arg2[%441, %c0_88, %c0_89] : memref<8x6x48xf32, #tpu.memory_space<vmem>>, vector<1x6x48xf32>
    %443 = vector.shape_cast %442 : vector<1x6x48xf32> to vector<6x48xf32>
    %cst_90 = arith.constant dense<0.000000e+00> : vector<6x48xf32>
    %444 = tpu.matmul %393, %3, %cst_90 {dimension_numbers = #tpu.dot_dimension_numbers<[1], [0], [0], [1], [0, 0, 1, 1], [], []>} : vector<6x16xf32>, vector<16x48xf32>, vector<6x48xf32> -> vector<6x48xf32>
    %445 = vector.extract_strided_slice %443 {offsets = [0, 0], sizes = [6, 16], strides = [1, 1]} : vector<6x48xf32> to vector<6x16xf32>
    %446 = vector.extract_strided_slice %444 {offsets = [0, 0], sizes = [6, 16], strides = [1, 1]} : vector<6x48xf32> to vector<6x16xf32>
    %447 = arith.addf %445, %446 : vector<6x16xf32>
    %448 = arith.negf %447 : vector<6x16xf32>
    %449 = math.exp %448 : vector<6x16xf32>
    %cst_91 = arith.constant 1.000000e+00 : f32
    %450 = vector.broadcast %cst_91 : f32 to vector<6x16xf32>
    %451 = arith.addf %450, %449 : vector<6x16xf32>
    %452 = arith.divf %450, %451 : vector<6x16xf32>
    %453 = vector.extract_strided_slice %443 {offsets = [0, 16], sizes = [6, 16], strides = [1, 1]} : vector<6x48xf32> to vector<6x16xf32>
    %454 = vector.extract_strided_slice %444 {offsets = [0, 16], sizes = [6, 16], strides = [1, 1]} : vector<6x48xf32> to vector<6x16xf32>
    %455 = arith.addf %453, %454 : vector<6x16xf32>
    %456 = arith.negf %455 : vector<6x16xf32>
    %457 = math.exp %456 : vector<6x16xf32>
    %cst_92 = arith.constant 1.000000e+00 : f32
    %458 = vector.broadcast %cst_92 : f32 to vector<6x16xf32>
    %459 = arith.addf %458, %457 : vector<6x16xf32>
    %460 = arith.divf %458, %459 : vector<6x16xf32>
    %461 = vector.extract_strided_slice %443 {offsets = [0, 32], sizes = [6, 16], strides = [1, 1]} : vector<6x48xf32> to vector<6x16xf32>
    %462 = vector.extract_strided_slice %444 {offsets = [0, 32], sizes = [6, 16], strides = [1, 1]} : vector<6x48xf32> to vector<6x16xf32>
    %463 = vector.broadcast %7 : vector<1x16xf32> to vector<6x16xf32>
    %464 = arith.addf %462, %463 : vector<6x16xf32>
    %465 = arith.mulf %452, %464 : vector<6x16xf32>
    %466 = arith.addf %461, %465 : vector<6x16xf32>
    %467 = math.tanh %466 : vector<6x16xf32>
    %cst_93 = arith.constant 1.000000e+00 : f32
    %468 = vector.broadcast %cst_93 : f32 to vector<6x16xf32>
    %469 = arith.subf %468, %460 : vector<6x16xf32>
    %470 = arith.mulf %469, %467 : vector<6x16xf32>
    %471 = arith.mulf %460, %393 : vector<6x16xf32>
    %472 = arith.addf %470, %471 : vector<6x16xf32>
    %c8_i32_94 = arith.constant 8 : i32
    %473 = vector.broadcast %c8_i32_94 : i32 to vector<6x1xi32>
    %474 = arith.subi %473, %8 : vector<6x1xi32>
    %475 = vector.broadcast %c5_i32 : i32 to vector<6x1xi32>
    %476 = arith.cmpi sge, %475, %474 : vector<6x1xi32>
    %477 = arith.maximumf %401, %437 : vector<6x16xf32>
    %478 = vector.shape_cast %439 : vector<6x1xi1> to vector<6x1xi1>
    %479 = vector.broadcast %478 : vector<6x1xi1> to vector<6x16xi1>
    %480 = arith.select %479, %477, %401 : vector<6x16xi1>, vector<6x16xf32>
    %481 = arith.maximumf %405, %472 : vector<6x16xf32>
    %482 = vector.shape_cast %476 : vector<6x1xi1> to vector<6x1xi1>
    %483 = vector.broadcast %482 : vector<6x1xi1> to vector<6x16xi1>
    %484 = arith.select %483, %481, %405 : vector<6x16xi1>, vector<6x16xf32>
    %c6_i32 = arith.constant 6 : i32
    %485 = arith.index_cast %c6_i32 : i32 to index
    %c0_95 = arith.constant 0 : index
    %c0_96 = arith.constant 0 : index
    %486 = vector.load %arg1[%485, %c0_95, %c0_96] : memref<8x6x48xf32, #tpu.memory_space<vmem>>, vector<1x6x48xf32>
    %487 = vector.shape_cast %486 : vector<1x6x48xf32> to vector<6x48xf32>
    %cst_97 = arith.constant dense<0.000000e+00> : vector<6x48xf32>
    %488 = tpu.matmul %437, %1, %cst_97 {dimension_numbers = #tpu.dot_dimension_numbers<[1], [0], [0], [1], [0, 0, 1, 1], [], []>} : vector<6x16xf32>, vector<16x48xf32>, vector<6x48xf32> -> vector<6x48xf32>
    %489 = vector.extract_strided_slice %487 {offsets = [0, 0], sizes = [6, 16], strides = [1, 1]} : vector<6x48xf32> to vector<6x16xf32>
    %490 = vector.extract_strided_slice %488 {offsets = [0, 0], sizes = [6, 16], strides = [1, 1]} : vector<6x48xf32> to vector<6x16xf32>
    %491 = arith.addf %489, %490 : vector<6x16xf32>
    %492 = arith.negf %491 : vector<6x16xf32>
    %493 = math.exp %492 : vector<6x16xf32>
    %cst_98 = arith.constant 1.000000e+00 : f32
    %494 = vector.broadcast %cst_98 : f32 to vector<6x16xf32>
    %495 = arith.addf %494, %493 : vector<6x16xf32>
    %496 = arith.divf %494, %495 : vector<6x16xf32>
    %497 = vector.extract_strided_slice %487 {offsets = [0, 16], sizes = [6, 16], strides = [1, 1]} : vector<6x48xf32> to vector<6x16xf32>
    %498 = vector.extract_strided_slice %488 {offsets = [0, 16], sizes = [6, 16], strides = [1, 1]} : vector<6x48xf32> to vector<6x16xf32>
    %499 = arith.addf %497, %498 : vector<6x16xf32>
    %500 = arith.negf %499 : vector<6x16xf32>
    %501 = math.exp %500 : vector<6x16xf32>
    %cst_99 = arith.constant 1.000000e+00 : f32
    %502 = vector.broadcast %cst_99 : f32 to vector<6x16xf32>
    %503 = arith.addf %502, %501 : vector<6x16xf32>
    %504 = arith.divf %502, %503 : vector<6x16xf32>
    %505 = vector.extract_strided_slice %487 {offsets = [0, 32], sizes = [6, 16], strides = [1, 1]} : vector<6x48xf32> to vector<6x16xf32>
    %506 = vector.extract_strided_slice %488 {offsets = [0, 32], sizes = [6, 16], strides = [1, 1]} : vector<6x48xf32> to vector<6x16xf32>
    %507 = vector.broadcast %5 : vector<1x16xf32> to vector<6x16xf32>
    %508 = arith.addf %506, %507 : vector<6x16xf32>
    %509 = arith.mulf %496, %508 : vector<6x16xf32>
    %510 = arith.addf %505, %509 : vector<6x16xf32>
    %511 = math.tanh %510 : vector<6x16xf32>
    %cst_100 = arith.constant 1.000000e+00 : f32
    %512 = vector.broadcast %cst_100 : f32 to vector<6x16xf32>
    %513 = arith.subf %512, %504 : vector<6x16xf32>
    %514 = arith.mulf %513, %511 : vector<6x16xf32>
    %515 = arith.mulf %504, %437 : vector<6x16xf32>
    %516 = arith.addf %514, %515 : vector<6x16xf32>
    %517 = vector.broadcast %c6_i32 : i32 to vector<6x1xi32>
    %518 = arith.cmpi sgt, %8, %517 : vector<6x1xi32>
    %c7_i32_101 = arith.constant 7 : i32
    %519 = arith.subi %c7_i32_101, %c6_i32 : i32
    %520 = arith.index_cast %519 : i32 to index
    %c0_102 = arith.constant 0 : index
    %c0_103 = arith.constant 0 : index
    %521 = vector.load %arg2[%520, %c0_102, %c0_103] : memref<8x6x48xf32, #tpu.memory_space<vmem>>, vector<1x6x48xf32>
    %522 = vector.shape_cast %521 : vector<1x6x48xf32> to vector<6x48xf32>
    %cst_104 = arith.constant dense<0.000000e+00> : vector<6x48xf32>
    %523 = tpu.matmul %472, %3, %cst_104 {dimension_numbers = #tpu.dot_dimension_numbers<[1], [0], [0], [1], [0, 0, 1, 1], [], []>} : vector<6x16xf32>, vector<16x48xf32>, vector<6x48xf32> -> vector<6x48xf32>
    %524 = vector.extract_strided_slice %522 {offsets = [0, 0], sizes = [6, 16], strides = [1, 1]} : vector<6x48xf32> to vector<6x16xf32>
    %525 = vector.extract_strided_slice %523 {offsets = [0, 0], sizes = [6, 16], strides = [1, 1]} : vector<6x48xf32> to vector<6x16xf32>
    %526 = arith.addf %524, %525 : vector<6x16xf32>
    %527 = arith.negf %526 : vector<6x16xf32>
    %528 = math.exp %527 : vector<6x16xf32>
    %cst_105 = arith.constant 1.000000e+00 : f32
    %529 = vector.broadcast %cst_105 : f32 to vector<6x16xf32>
    %530 = arith.addf %529, %528 : vector<6x16xf32>
    %531 = arith.divf %529, %530 : vector<6x16xf32>
    %532 = vector.extract_strided_slice %522 {offsets = [0, 16], sizes = [6, 16], strides = [1, 1]} : vector<6x48xf32> to vector<6x16xf32>
    %533 = vector.extract_strided_slice %523 {offsets = [0, 16], sizes = [6, 16], strides = [1, 1]} : vector<6x48xf32> to vector<6x16xf32>
    %534 = arith.addf %532, %533 : vector<6x16xf32>
    %535 = arith.negf %534 : vector<6x16xf32>
    %536 = math.exp %535 : vector<6x16xf32>
    %cst_106 = arith.constant 1.000000e+00 : f32
    %537 = vector.broadcast %cst_106 : f32 to vector<6x16xf32>
    %538 = arith.addf %537, %536 : vector<6x16xf32>
    %539 = arith.divf %537, %538 : vector<6x16xf32>
    %540 = vector.extract_strided_slice %522 {offsets = [0, 32], sizes = [6, 16], strides = [1, 1]} : vector<6x48xf32> to vector<6x16xf32>
    %541 = vector.extract_strided_slice %523 {offsets = [0, 32], sizes = [6, 16], strides = [1, 1]} : vector<6x48xf32> to vector<6x16xf32>
    %542 = vector.broadcast %7 : vector<1x16xf32> to vector<6x16xf32>
    %543 = arith.addf %541, %542 : vector<6x16xf32>
    %544 = arith.mulf %531, %543 : vector<6x16xf32>
    %545 = arith.addf %540, %544 : vector<6x16xf32>
    %546 = math.tanh %545 : vector<6x16xf32>
    %cst_107 = arith.constant 1.000000e+00 : f32
    %547 = vector.broadcast %cst_107 : f32 to vector<6x16xf32>
    %548 = arith.subf %547, %539 : vector<6x16xf32>
    %549 = arith.mulf %548, %546 : vector<6x16xf32>
    %550 = arith.mulf %539, %472 : vector<6x16xf32>
    %551 = arith.addf %549, %550 : vector<6x16xf32>
    %c8_i32_108 = arith.constant 8 : i32
    %552 = vector.broadcast %c8_i32_108 : i32 to vector<6x1xi32>
    %553 = arith.subi %552, %8 : vector<6x1xi32>
    %554 = vector.broadcast %c6_i32 : i32 to vector<6x1xi32>
    %555 = arith.cmpi sge, %554, %553 : vector<6x1xi32>
    %556 = arith.maximumf %480, %516 : vector<6x16xf32>
    %557 = vector.shape_cast %518 : vector<6x1xi1> to vector<6x1xi1>
    %558 = vector.broadcast %557 : vector<6x1xi1> to vector<6x16xi1>
    %559 = arith.select %558, %556, %480 : vector<6x16xi1>, vector<6x16xf32>
    %560 = arith.maximumf %484, %551 : vector<6x16xf32>
    %561 = vector.shape_cast %555 : vector<6x1xi1> to vector<6x1xi1>
    %562 = vector.broadcast %561 : vector<6x1xi1> to vector<6x16xi1>
    %563 = arith.select %562, %560, %484 : vector<6x16xi1>, vector<6x16xf32>
    %c7_i32_109 = arith.constant 7 : i32
    %564 = arith.index_cast %c7_i32_109 : i32 to index
    %c0_110 = arith.constant 0 : index
    %c0_111 = arith.constant 0 : index
    %565 = vector.load %arg1[%564, %c0_110, %c0_111] : memref<8x6x48xf32, #tpu.memory_space<vmem>>, vector<1x6x48xf32>
    %566 = vector.shape_cast %565 : vector<1x6x48xf32> to vector<6x48xf32>
    %cst_112 = arith.constant dense<0.000000e+00> : vector<6x48xf32>
    %567 = tpu.matmul %516, %1, %cst_112 {dimension_numbers = #tpu.dot_dimension_numbers<[1], [0], [0], [1], [0, 0, 1, 1], [], []>} : vector<6x16xf32>, vector<16x48xf32>, vector<6x48xf32> -> vector<6x48xf32>
    %568 = vector.extract_strided_slice %566 {offsets = [0, 0], sizes = [6, 16], strides = [1, 1]} : vector<6x48xf32> to vector<6x16xf32>
    %569 = vector.extract_strided_slice %567 {offsets = [0, 0], sizes = [6, 16], strides = [1, 1]} : vector<6x48xf32> to vector<6x16xf32>
    %570 = arith.addf %568, %569 : vector<6x16xf32>
    %571 = arith.negf %570 : vector<6x16xf32>
    %572 = math.exp %571 : vector<6x16xf32>
    %cst_113 = arith.constant 1.000000e+00 : f32
    %573 = vector.broadcast %cst_113 : f32 to vector<6x16xf32>
    %574 = arith.addf %573, %572 : vector<6x16xf32>
    %575 = arith.divf %573, %574 : vector<6x16xf32>
    %576 = vector.extract_strided_slice %566 {offsets = [0, 16], sizes = [6, 16], strides = [1, 1]} : vector<6x48xf32> to vector<6x16xf32>
    %577 = vector.extract_strided_slice %567 {offsets = [0, 16], sizes = [6, 16], strides = [1, 1]} : vector<6x48xf32> to vector<6x16xf32>
    %578 = arith.addf %576, %577 : vector<6x16xf32>
    %579 = arith.negf %578 : vector<6x16xf32>
    %580 = math.exp %579 : vector<6x16xf32>
    %cst_114 = arith.constant 1.000000e+00 : f32
    %581 = vector.broadcast %cst_114 : f32 to vector<6x16xf32>
    %582 = arith.addf %581, %580 : vector<6x16xf32>
    %583 = arith.divf %581, %582 : vector<6x16xf32>
    %584 = vector.extract_strided_slice %566 {offsets = [0, 32], sizes = [6, 16], strides = [1, 1]} : vector<6x48xf32> to vector<6x16xf32>
    %585 = vector.extract_strided_slice %567 {offsets = [0, 32], sizes = [6, 16], strides = [1, 1]} : vector<6x48xf32> to vector<6x16xf32>
    %586 = vector.broadcast %5 : vector<1x16xf32> to vector<6x16xf32>
    %587 = arith.addf %585, %586 : vector<6x16xf32>
    %588 = arith.mulf %575, %587 : vector<6x16xf32>
    %589 = arith.addf %584, %588 : vector<6x16xf32>
    %590 = math.tanh %589 : vector<6x16xf32>
    %cst_115 = arith.constant 1.000000e+00 : f32
    %591 = vector.broadcast %cst_115 : f32 to vector<6x16xf32>
    %592 = arith.subf %591, %583 : vector<6x16xf32>
    %593 = arith.mulf %592, %590 : vector<6x16xf32>
    %594 = arith.mulf %583, %516 : vector<6x16xf32>
    %595 = arith.addf %593, %594 : vector<6x16xf32>
    %596 = vector.broadcast %c7_i32_109 : i32 to vector<6x1xi32>
    %597 = arith.cmpi sgt, %8, %596 : vector<6x1xi32>
    %c7_i32_116 = arith.constant 7 : i32
    %598 = arith.subi %c7_i32_116, %c7_i32_109 : i32
    %599 = arith.index_cast %598 : i32 to index
    %c0_117 = arith.constant 0 : index
    %c0_118 = arith.constant 0 : index
    %600 = vector.load %arg2[%599, %c0_117, %c0_118] : memref<8x6x48xf32, #tpu.memory_space<vmem>>, vector<1x6x48xf32>
    %601 = vector.shape_cast %600 : vector<1x6x48xf32> to vector<6x48xf32>
    %cst_119 = arith.constant dense<0.000000e+00> : vector<6x48xf32>
    %602 = tpu.matmul %551, %3, %cst_119 {dimension_numbers = #tpu.dot_dimension_numbers<[1], [0], [0], [1], [0, 0, 1, 1], [], []>} : vector<6x16xf32>, vector<16x48xf32>, vector<6x48xf32> -> vector<6x48xf32>
    %603 = vector.extract_strided_slice %601 {offsets = [0, 0], sizes = [6, 16], strides = [1, 1]} : vector<6x48xf32> to vector<6x16xf32>
    %604 = vector.extract_strided_slice %602 {offsets = [0, 0], sizes = [6, 16], strides = [1, 1]} : vector<6x48xf32> to vector<6x16xf32>
    %605 = arith.addf %603, %604 : vector<6x16xf32>
    %606 = arith.negf %605 : vector<6x16xf32>
    %607 = math.exp %606 : vector<6x16xf32>
    %cst_120 = arith.constant 1.000000e+00 : f32
    %608 = vector.broadcast %cst_120 : f32 to vector<6x16xf32>
    %609 = arith.addf %608, %607 : vector<6x16xf32>
    %610 = arith.divf %608, %609 : vector<6x16xf32>
    %611 = vector.extract_strided_slice %601 {offsets = [0, 16], sizes = [6, 16], strides = [1, 1]} : vector<6x48xf32> to vector<6x16xf32>
    %612 = vector.extract_strided_slice %602 {offsets = [0, 16], sizes = [6, 16], strides = [1, 1]} : vector<6x48xf32> to vector<6x16xf32>
    %613 = arith.addf %611, %612 : vector<6x16xf32>
    %614 = arith.negf %613 : vector<6x16xf32>
    %615 = math.exp %614 : vector<6x16xf32>
    %cst_121 = arith.constant 1.000000e+00 : f32
    %616 = vector.broadcast %cst_121 : f32 to vector<6x16xf32>
    %617 = arith.addf %616, %615 : vector<6x16xf32>
    %618 = arith.divf %616, %617 : vector<6x16xf32>
    %619 = vector.extract_strided_slice %601 {offsets = [0, 32], sizes = [6, 16], strides = [1, 1]} : vector<6x48xf32> to vector<6x16xf32>
    %620 = vector.extract_strided_slice %602 {offsets = [0, 32], sizes = [6, 16], strides = [1, 1]} : vector<6x48xf32> to vector<6x16xf32>
    %621 = vector.broadcast %7 : vector<1x16xf32> to vector<6x16xf32>
    %622 = arith.addf %620, %621 : vector<6x16xf32>
    %623 = arith.mulf %610, %622 : vector<6x16xf32>
    %624 = arith.addf %619, %623 : vector<6x16xf32>
    %625 = math.tanh %624 : vector<6x16xf32>
    %cst_122 = arith.constant 1.000000e+00 : f32
    %626 = vector.broadcast %cst_122 : f32 to vector<6x16xf32>
    %627 = arith.subf %626, %618 : vector<6x16xf32>
    %628 = arith.mulf %627, %625 : vector<6x16xf32>
    %629 = arith.mulf %618, %551 : vector<6x16xf32>
    %630 = arith.addf %628, %629 : vector<6x16xf32>
    %c8_i32_123 = arith.constant 8 : i32
    %631 = vector.broadcast %c8_i32_123 : i32 to vector<6x1xi32>
    %632 = arith.subi %631, %8 : vector<6x1xi32>
    %633 = vector.broadcast %c7_i32_109 : i32 to vector<6x1xi32>
    %634 = arith.cmpi sge, %633, %632 : vector<6x1xi32>
    %635 = arith.maximumf %559, %595 : vector<6x16xf32>
    %636 = vector.shape_cast %597 : vector<6x1xi1> to vector<6x1xi1>
    %637 = vector.broadcast %636 : vector<6x1xi1> to vector<6x16xi1>
    %638 = arith.select %637, %635, %559 : vector<6x16xi1>, vector<6x16xf32>
    %639 = arith.maximumf %563, %630 : vector<6x16xf32>
    %640 = vector.shape_cast %634 : vector<6x1xi1> to vector<6x1xi1>
    %641 = vector.broadcast %640 : vector<6x1xi1> to vector<6x16xi1>
    %642 = arith.select %641, %639, %563 : vector<6x16xi1>, vector<6x16xf32>
    %c8_i32_124 = arith.constant 8 : i32
    %643 = tpu.concatenate %638, %642 in 1 : vector<6x16xf32>, vector<6x16xf32> -> vector<6x32xf32>
    %c0_i32_125 = arith.constant 0 : i32
    %644 = vector.broadcast %c0_i32_125 : i32 to vector<6x1xi32>
    %645 = arith.cmpi sgt, %8, %644 : vector<6x1xi32>
    %cst_126 = arith.constant 0.000000e+00 : f32
    %646 = vector.shape_cast %645 : vector<6x1xi1> to vector<6x1xi1>
    %647 = vector.broadcast %646 : vector<6x1xi1> to vector<6x32xi1>
    %648 = vector.broadcast %cst_126 : f32 to vector<6x32xf32>
    %649 = arith.select %647, %643, %648 : vector<6x32xi1>, vector<6x32xf32>
    %c0_127 = arith.constant 0 : index
    %c0_128 = arith.constant 0 : index
    %650 = vector.load %arg6[%c0_127, %c0_128] : memref<6x32xf32, #tpu.memory_space<vmem>>, vector<6x32xf32>
    tpu.vector_store %arg6[%c0_127, %c0_128], %649 {strides = array<i32>} : memref<6x32xf32, #tpu.memory_space<vmem>>, vector<6x32xf32>,
    return
  }
  func.func @transform_0(%arg0: i32) -> (i32, i32, i32) {
    %c0_i32 = arith.constant 0 : i32
    %c0_i32_0 = arith.constant 0 : i32
    %c0_i32_1 = arith.constant 0 : i32
    return %c0_i32, %arg0, %c0_i32_0 : i32, i32, i32
  }
  func.func @transform_1(%arg0: i32) -> (i32, i32, i32) {
    %c0_i32 = arith.constant 0 : i32
    %c0_i32_0 = arith.constant 0 : i32
    %c0_i32_1 = arith.constant 0 : i32
    return %c0_i32, %arg0, %c0_i32_0 : i32, i32, i32
  }
  func.func @transform_2(%arg0: i32) -> (i32, i32, i32) {
    %c0_i32 = arith.constant 0 : i32
    %c0_i32_0 = arith.constant 0 : i32
    %c0_i32_1 = arith.constant 0 : i32
    %c0_i32_2 = arith.constant 0 : i32
    return %c0_i32, %c0_i32_0, %c0_i32_1 : i32, i32, i32
  }
  func.func @transform_3(%arg0: i32) -> (i32, i32, i32) {
    %c0_i32 = arith.constant 0 : i32
    %c0_i32_0 = arith.constant 0 : i32
    %c0_i32_1 = arith.constant 0 : i32
    %c0_i32_2 = arith.constant 0 : i32
    return %c0_i32, %c0_i32_0, %c0_i32_1 : i32, i32, i32
  }
  func.func @transform_4(%arg0: i32) -> (i32, i32) {
    %c0_i32 = arith.constant 0 : i32
    %c0_i32_0 = arith.constant 0 : i32
    return %arg0, %c0_i32 : i32, i32
  }
  func.func @transform_5(%arg0: i32) -> (i32, i32) {
    %c0_i32 = arith.constant 0 : i32
    %c0_i32_0 = arith.constant 0 : i32
    return %arg0, %c0_i32 : i32, i32
  }
}

</mosaic_0001>

<bundles_post_ra>
// kernel: tpu_custom_call.1
= control target key start
LH: loop header
LB: loop body
LE: loop exit
PB: predicated region body
PF: predicated region fallthrough
CT: control target
= control target key end

     0   :  { %v2238_v3 = vmov 0.0|0.0   ;;  %vm2239_vm0 = vmmov 0   ;;  %v2240_v5 = vmov 0.0   ;;  %s2632_s0 = inlined_call_operand.vmem [shape: f32[8,6,48], index: 0, kind: input, shape index: {}]   ;;  %s2633_s1 = inlined_call_operand.vmem [shape: f32[8,6,48], index: 1, kind: input, shape index: {}]   ;;  %s2634_s2 = inlined_call_operand.vmem [shape: f32[2,16,48], index: 2, kind: input, shape index: {}]   ;;  %s2635_s3 = inlined_call_operand.vmem [shape: f32[2,1,16], index: 3, kind: input, shape index: {}]   ;;  %s2636_s4 = inlined_call_operand.vmem [shape: s32[6,1], index: 4, kind: input, shape index: {}]   ;;  %s2637_s5 = inlined_call_operand.hbm [shape: f32[6,32], index: 5, kind: output, shape index: {}]  }
   0x1   :  { %v21_v0 = vld [vmem:[%s2634_s2] sm:$0xff]  ;;  %v22_v1 = vld [vmem:[%s2634_s2 + $0x8] sm:$0xff]  ;;  %v1851_v2 = vld [vmem:[%s2634_s2 + $0x10] sm:$0xff]  ;;  %2060 = vmatprep.subr.bf16.mxu0 %v2238_v3  ;;  %1952 = vmatprep.mubr.msk.f32.mxu0 %vm2239_vm0, %v2240_v5 }
   0x2   :  { %v2286_v4 = vpack.c.bf16 %v22_v1, %v21_v0  ;;  %v1852_v6 = vld [vmem:[%s2634_s2 + $0x18] sm:$0xff]  ;;  %v1855_v7 = vld [vmem:[%s2635_s3] ss:$0 sm:$0xff]  ;;  %2063 = vmatprep.subr.bf16.mxu1 %v2238_v3  ;;  %1959 = vmatprep.mubr.msk.f32.mxu1 %vm2239_vm0, %v2240_v5 }
   0x3   :  { %v2297_v8 = vpack.c.bf16 %v1852_v6, %v1851_v2 }
   0x4   :  { %10 = vsyncpa [#allocation3], 0  ;;  %2062 = vmatpush3.bf16.msra.mxu0 %v2286_v4  ;;  %s2241_s28 = smov 32   ;;  %v1858_v9 = vld [vmem:[%s2635_s3 + $0x1] ss:$0 sm:$0xff]  ;;  %s2242_s3 = smov 96  }
   0x5   :  { %117 = vrot.lane.b32.xlu0 %v1855_v7, %s2241_s28  ;;  %2065 = vmatpush3.bf16.msra.mxu1 %v2297_v8  ;;  %v30_v18 = vld [vmem:[%s2632_s0] sm:$0x3f]  ;;  %v1856_v19 = vld [vmem:[%s2633_s1 + $0x38] sm:$0x3f]  ;;  %s2243_s9 = smov 112   ;;  %vm31_vm1 = vcmask 130048  }
   0x6   :  { %2066 = vmatprep.subr.bf16.mxu0 %v2238_v3  ;;  %2069 = vmatprep.subr.bf16.mxu1 %v2238_v3  ;;  %v1859_v58 = vld [vmem:[%s2632_s0 + $0x8] sm:$0x3f]  ;;  %v1862_v60 = vld [vmem:[%s2633_s1 + $0x30] sm:$0x3f] }
   0x7   :  { %1953 = vmatmul.mubr.f32.vlgmr.msra.gmra.mrb[0].mxu0 %v2240_v5 }
   0x8   :  { %1960 = vmatmul.mubr.f32.vlgmr.msra.gmra.mrb[0].mxu1 %v2240_v5  ;;  %2068 = vmatpush3.bf16.msra.mxu0 %v2286_v4 }
   0x9   :  { %225 = vrot.lane.b32.xlu0 %v1858_v9, %s2241_s28  ;;  %1966 = vmatprep.mubr.msk.f32.mxu0 %vm2239_vm0, %v2240_v5 }
   0xa   :  { %2071 = vmatpush3.bf16.msra.mxu1 %v2297_v8  ;;  %1973 = vmatprep.mubr.msk.f32.mxu1 %vm2239_vm0, %v2240_v5 }
   0xb   :  { %2072 = vmatprep.subr.bf16.mxu0 %v2238_v3  ;;  %2075 = vmatprep.subr.bf16.mxu1 %v2238_v3 }
  0x77   :  { %v2320_v10 = vpop.permute.xlu0 %117 }
  0x7b   :  { %v2322_v12 = vpop.permute.xlu0 %225 }
  0xda   :  { %v101_v11 = vpop.f32.mrb[0].mxu0 }
  0xdb   :  { %v1954_v13 = vpop.f32.mrb[1].mxu0  ;;  %v120_v14 = vadd.f32 %v2320_v10, %v101_v11  ;;  %v209_v15 = vpop.f32.mrb[0].mxu1  ;;  %v105_v20 = vadd.f32 %v101_v11, %v30_v18 }
  0xdc   :  { %v1961_v16 = vpop.f32.mrb[1].mxu1  ;;  %v228_v17 = vadd.f32 %v2322_v12, %v209_v15  ;;  %v213_v21 = vadd.f32 %v1856_v19, %v209_v15 }
  0xdd   :  { %122 = vrot.lane.b32.xlu1 %v120_v14, %s2242_s3  ;;  %v1854_v22 = vmul.f32 -1.442695, %v105_v20 }
  0xde   :  { %v1857_v23 = vmul.f32 -1.442695, %v213_v21 }
  0xdf   :  { %2118 = vpow2.f32 %v1854_v22 }
  0xe0   :  { %2120 = vpow2.f32 %v1857_v23 }
  0xe1   :  { %230 = vrot.lane.b32.xlu1 %v228_v17, %s2242_s3 }
  0xe9   :  { %v2119_v24 = vpop.eup %2118 }
  0xea   :  { %v2121_v25 = vpop.eup %2120  ;;  %v109_v26 = vadd.f32 1.0, %v2119_v24 }
  0xeb   :  { %v217_v27 = vadd.f32 1.0, %v2121_v25 }
  0xec   :  { %2122 = vrcp.f32 %v109_v26 }
  0xed   :  { %2124 = vrcp.f32 %v217_v27 }
  0xf6   :  { %v2123_v28 = vpop.eup %2122 }
  0xf7   :  { %v2125_v31 = vpop.eup %2124  ;;  %v132_v40 = vsub.f32 1.0, %v2123_v28  ;;  %v138_v42 = vmul.f32 0.0, %v2123_v28 }
  0xf8   :  { %v240_v45 = vsub.f32 1.0, %v2125_v31  ;;  %v246_v47 = vmul.f32 0.0, %v2125_v31 }
 0x14f   :  { %v123_v29 = vpop.permute.xlu1 %122 }
 0x150   :  { %v125_v30 = vmul.f32 %v2123_v28, %v123_v29 }
 0x152   :  { %127 = vrot.lane.b32.xlu0 %v125_v30, %s2241_s28 }
 0x153   :  { %v231_v32 = vpop.permute.xlu1 %230 }
 0x154   :  { %v233_v33 = vmul.f32 %v2125_v31, %v231_v32 }
 0x156   :  { %235 = vrot.lane.b32.xlu1 %v233_v33, %s2241_s28 }
 0x1c4   :  { %v128_v34 = vpop.permute.xlu0 %127 }
 0x1c5   :  { %v130_v35 = vadd.f32 %v128_v34, %v30_v18 }
 0x1c7   :  { %2126 = vtanh.f32 %v130_v35 }
 0x1c8   :  { %v236_v36 = vpop.permute.xlu1 %235 }
 0x1c9   :  { %v238_v37 = vadd.f32 %v1856_v19, %v236_v36 }
 0x1cb   :  { %2128 = vtanh.f32 %v238_v37 }
 0x1d1   :  { %v2127_v38 = vpop.eup %2126 }
 0x1d2   :  { %134 = vrot.lane.b32.xlu0 %v2127_v38, %s2243_s9 }
 0x1d5   :  { %v2129_v39 = vpop.eup %2128 }
 0x1d6   :  { %242 = vrot.lane.b32.xlu1 %v2129_v39, %s2243_s9 }
 0x244   :  { %v135_v41 = vpop.permute.xlu0 %134 }
 0x245   :  { %v137_v43 = vmul.f32 %v135_v41, %v132_v40  ;;  %v1865_v40 = vld [vmem:[%s2632_s0 + $0x10] sm:$0x3f] }
 0x247   :  { %v2338_v44 = vadd.f32 %v138_v42, %v137_v43  ;;  %v1868_v42 = vld [vmem:[%s2633_s1 + $0x28] sm:$0x3f] }
 0x248   :  { %v243_v46 = vpop.permute.xlu1 %242 }
 0x249   :  { %v245_v48 = vmul.f32 %v243_v46, %v240_v45  ;;  %265 = vrot.lane.b32.xlu0 %v2338_v44, %s2243_s9 }
 0x24b   :  { %v2342_v49 = vadd.f32 %v246_v47, %v245_v48 }
 0x24d   :  { %370 = vrot.lane.b32.xlu1 %v2342_v49, %s2243_s9 }
 0x2bb   :  { %v266_v50 = vpop.permute.xlu0 %265 }
 0x2bc   :  { %1967 = vmatmul.mubr.msk.f32.vlgmr.msra.gmra.mrb[2].mxu0 %vm31_vm1, %v266_v50 }
 0x2bd   :  { %2074 = vmatpush3.bf16.msra.mxu0 %v2286_v4  ;;  %1980 = vmatprep.mubr.msk.f32.mxu0 %vm2239_vm0, %v2240_v5 }
 0x2be   :  { %2078 = vmatprep.subr.bf16.mxu0 %v2238_v3 }
 0x2bf   :  { %v371_v51 = vpop.permute.xlu1 %370 }
 0x2c0   :  { %1974 = vmatmul.mubr.msk.f32.vlgmr.msra.gmra.mrb[2].mxu1 %vm31_vm1, %v371_v51 }
 0x2c1   :  { %2077 = vmatpush3.bf16.msra.mxu1 %v2297_v8  ;;  %1987 = vmatprep.mubr.msk.f32.mxu1 %vm2239_vm0, %v2240_v5 }
 0x2c2   :  { %2081 = vmatprep.subr.bf16.mxu1 %v2238_v3 }
 0x38f   :  { %v335_v52 = vpop.f32.mrb[2].mxu0 }
 0x390   :  { %v346_v53 = vadd.f32 %v335_v52, %v2320_v10  ;;  %v1968_v54 = vpop.f32.mrb[3].mxu0  ;;  %v339_v59 = vadd.f32 %v1859_v58, %v335_v52 }
 0x392   :  { %348 = vrot.lane.b32.xlu0 %v346_v53, %s2242_s3  ;;  %v1861_v61 = vmul.f32 -1.442695, %v339_v59 }
 0x393   :  { %v440_v55 = vpop.f32.mrb[2].mxu1 }
 0x394   :  { %v451_v56 = vadd.f32 %v440_v55, %v2322_v12  ;;  %v1975_v57 = vpop.f32.mrb[3].mxu1  ;;  %v444_v62 = vadd.f32 %v1862_v60, %v440_v55  ;;  %2130 = vpow2.f32 %v1861_v61 }
 0x396   :  { %453 = vrot.lane.b32.xlu1 %v451_v56, %s2242_s3  ;;  %v1864_v63 = vmul.f32 -1.442695, %v444_v62 }
 0x398   :  { %2132 = vpow2.f32 %v1864_v63 }
 0x39e   :  { %v2131_v0 = vpop.eup %2130 }
 0x39f   :  { %v343_v1 = vadd.f32 1.0, %v2131_v0 }
 0x3a1   :  { %2134 = vrcp.f32 %v343_v1 }
 0x3a2   :  { %v2133_v2 = vpop.eup %2132 }
 0x3a3   :  { %v448_v6 = vadd.f32 1.0, %v2133_v2 }
 0x3a5   :  { %2136 = vrcp.f32 %v448_v6 }
 0x3ab   :  { %v2135_v7 = vpop.eup %2134 }
 0x3ac   :  { %v358_v22 = vsub.f32 1.0, %v2135_v7  ;;  %v364_v24 = vmul.f32 %v2135_v7, %v2338_v44 }
 0x3af   :  { %v2137_v13 = vpop.eup %2136 }
 0x3b0   :  { %v463_v27 = vsub.f32 1.0, %v2137_v13  ;;  %v469_v29 = vmul.f32 %v2137_v13, %v2342_v49 }
 0x404   :  { %v349_v9 = vpop.permute.xlu0 %348 }
 0x405   :  { %v351_v11 = vmul.f32 %v2135_v7, %v349_v9 }
 0x407   :  { %353 = vrot.lane.b32.xlu0 %v351_v11, %s2241_s28 }
 0x408   :  { %v454_v14 = vpop.permute.xlu1 %453 }
 0x409   :  { %v456_v15 = vmul.f32 %v2137_v13, %v454_v14 }
 0x40b   :  { %458 = vrot.lane.b32.xlu1 %v456_v15, %s2241_s28 }
 0x479   :  { %v354_v16 = vpop.permute.xlu0 %353 }
 0x47a   :  { %v356_v17 = vadd.f32 %v1859_v58, %v354_v16 }
 0x47c   :  { %2138 = vtanh.f32 %v356_v17 }
 0x47d   :  { %v459_v18 = vpop.permute.xlu1 %458 }
 0x47e   :  { %v461_v19 = vadd.f32 %v1862_v60, %v459_v18 }
 0x480   :  { %2140 = vtanh.f32 %v461_v19 }
 0x486   :  { %v2139_v20 = vpop.eup %2138 }
 0x487   :  { %360 = vrot.lane.b32.xlu0 %v2139_v20, %s2243_s9 }
 0x48a   :  { %v2141_v21 = vpop.eup %2140 }
 0x48b   :  { %465 = vrot.lane.b32.xlu1 %v2141_v21, %s2243_s9 }
 0x4f9   :  { %v361_v23 = vpop.permute.xlu0 %360 }
 0x4fa   :  { %v363_v25 = vmul.f32 %v361_v23, %v358_v22 }
 0x4fc   :  { %v2371_v26 = vadd.f32 %v364_v24, %v363_v25  ;;  %v1871_v24 = vld [vmem:[%s2632_s0 + $0x18] sm:$0x3f] }
 0x4fd   :  { %v466_v28 = vpop.permute.xlu1 %465 }
 0x4fe   :  { %v468_v30 = vmul.f32 %v466_v28, %v463_v27  ;;  %489 = vrot.lane.b32.xlu0 %v2371_v26, %s2243_s9  ;;  %v1874_v27 = vld [vmem:[%s2633_s1 + $0x20] sm:$0x3f] }
 0x500   :  { %v2376_v31 = vadd.f32 %v469_v29, %v468_v30 }
 0x502   :  { %594 = vrot.lane.b32.xlu1 %v2376_v31, %s2243_s9 }
 0x570   :  { %v490_v32 = vpop.permute.xlu0 %489 }
 0x571   :  { %1981 = vmatmul.mubr.msk.f32.vlgmr.msra.gmra.mrb[4].mxu0 %vm31_vm1, %v490_v32 }
 0x572   :  { %2080 = vmatpush3.bf16.msra.mxu0 %v2286_v4  ;;  %1994 = vmatprep.mubr.msk.f32.mxu0 %vm2239_vm0, %v2240_v5 }
 0x573   :  { %2084 = vmatprep.subr.bf16.mxu0 %v2238_v3 }
 0x574   :  { %v595_v33 = vpop.permute.xlu1 %594 }
 0x575   :  { %1988 = vmatmul.mubr.msk.f32.vlgmr.msra.gmra.mrb[4].mxu1 %vm31_vm1, %v595_v33 }
 0x576   :  { %2083 = vmatpush3.bf16.msra.mxu1 %v2297_v8  ;;  %2001 = vmatprep.mubr.msk.f32.mxu1 %vm2239_vm0, %v2240_v5 }
 0x577   :  { %2087 = vmatprep.subr.bf16.mxu1 %v2238_v3 }
 0x644   :  { %v559_v34 = vpop.f32.mrb[4].mxu0 }
 0x645   :  { %v570_v35 = vadd.f32 %v559_v34, %v2320_v10  ;;  %v1982_v36 = vpop.f32.mrb[5].mxu0  ;;  %v563_v41 = vadd.f32 %v1865_v40, %v559_v34 }
 0x647   :  { %572 = vrot.lane.b32.xlu0 %v570_v35, %s2242_s3  ;;  %v1867_v43 = vmul.f32 -1.442695, %v563_v41 }
 0x648   :  { %v664_v37 = vpop.f32.mrb[4].mxu1 }
 0x649   :  { %v675_v38 = vadd.f32 %v664_v37, %v2322_v12  ;;  %v1989_v39 = vpop.f32.mrb[5].mxu1  ;;  %v668_v45 = vadd.f32 %v1868_v42, %v664_v37  ;;  %2142 = vpow2.f32 %v1867_v43 }
 0x64b   :  { %677 = vrot.lane.b32.xlu1 %v675_v38, %s2242_s3  ;;  %v1870_v46 = vmul.f32 -1.442695, %v668_v45 }
 0x64d   :  { %2144 = vpow2.f32 %v1870_v46 }
 0x653   :  { %v2143_v47 = vpop.eup %2142 }
 0x654   :  { %v567_v48 = vadd.f32 1.0, %v2143_v47 }
 0x656   :  { %2146 = vrcp.f32 %v567_v48 }
 0x657   :  { %v2145_v50 = vpop.eup %2144 }
 0x658   :  { %v672_v51 = vadd.f32 1.0, %v2145_v50 }
 0x65a   :  { %2148 = vrcp.f32 %v672_v51 }
 0x660   :  { %v2147_v52 = vpop.eup %2146 }
 0x661   :  { %v582_v0 = vsub.f32 1.0, %v2147_v52  ;;  %v588_v2 = vmul.f32 %v2147_v52, %v2371_v26 }
 0x664   :  { %v2149_v55 = vpop.eup %2148 }
 0x665   :  { %v687_v9 = vsub.f32 1.0, %v2149_v55  ;;  %v693_v13 = vmul.f32 %v2149_v55, %v2376_v31 }
 0x6b9   :  { %v573_v53 = vpop.permute.xlu0 %572 }
 0x6ba   :  { %v575_v54 = vmul.f32 %v2147_v52, %v573_v53 }
 0x6bc   :  { %577 = vrot.lane.b32.xlu0 %v575_v54, %s2241_s28 }
 0x6bd   :  { %v678_v56 = vpop.permute.xlu1 %677 }
 0x6be   :  { %v680_v57 = vmul.f32 %v2149_v55, %v678_v56 }
 0x6c0   :  { %682 = vrot.lane.b32.xlu1 %v680_v57, %s2241_s28 }
 0x72e   :  { %v578_v58 = vpop.permute.xlu0 %577 }
 0x72f   :  { %v580_v59 = vadd.f32 %v1865_v40, %v578_v58 }
 0x731   :  { %2150 = vtanh.f32 %v580_v59 }
 0x732   :  { %v683_v60 = vpop.permute.xlu1 %682 }
 0x733   :  { %v685_v61 = vadd.f32 %v1868_v42, %v683_v60 }
 0x735   :  { %2152 = vtanh.f32 %v685_v61 }
 0x73b   :  { %v2151_v62 = vpop.eup %2150 }
 0x73c   :  { %584 = vrot.lane.b32.xlu0 %v2151_v62, %s2243_s9 }
 0x73f   :  { %v2153_v63 = vpop.eup %2152 }
 0x740   :  { %689 = vrot.lane.b32.xlu1 %v2153_v63, %s2243_s9 }
 0x7ae   :  { %v585_v1 = vpop.permute.xlu0 %584 }
 0x7af   :  { %v587_v6 = vmul.f32 %v585_v1, %v582_v0 }
 0x7b1   :  { %v2405_v7 = vadd.f32 %v588_v2, %v587_v6 }
 0x7b2   :  { %v690_v11 = vpop.permute.xlu1 %689 }
 0x7b3   :  { %v692_v14 = vmul.f32 %v690_v11, %v687_v9  ;;  %713 = vrot.lane.b32.xlu0 %v2405_v7, %s2243_s9  ;;  %v1877_v9 = vld [vmem:[%s2632_s0 + $0x20] sm:$0x3f] }
 0x7b5   :  { %v2410_v15 = vadd.f32 %v693_v13, %v692_v14  ;;  %v1880_v13 = vld [vmem:[%s2633_s1 + $0x18] sm:$0x3f] }
 0x7b7   :  { %818 = vrot.lane.b32.xlu1 %v2410_v15, %s2243_s9 }
 0x825   :  { %v714_v16 = vpop.permute.xlu0 %713 }
 0x826   :  { %1995 = vmatmul.mubr.msk.f32.vlgmr.msra.gmra.mrb[6].mxu0 %vm31_vm1, %v714_v16 }
 0x827   :  { %2086 = vmatpush3.bf16.msra.mxu0 %v2286_v4  ;;  %2008 = vmatprep.mubr.msk.f32.mxu0 %vm2239_vm0, %v2240_v5 }
 0x828   :  { %2090 = vmatprep.subr.bf16.mxu0 %v2238_v3 }
 0x829   :  { %v819_v17 = vpop.permute.xlu1 %818 }
 0x82a   :  { %2002 = vmatmul.mubr.msk.f32.vlgmr.msra.gmra.mrb[6].mxu1 %vm31_vm1, %v819_v17 }
 0x82b   :  { %2089 = vmatpush3.bf16.msra.mxu1 %v2297_v8  ;;  %2015 = vmatprep.mubr.msk.f32.mxu1 %vm2239_vm0, %v2240_v5 }
 0x82c   :  { %2093 = vmatprep.subr.bf16.mxu1 %v2238_v3 }
 0x8f9   :  { %v783_v18 = vpop.f32.mrb[6].mxu0 }
 0x8fa   :  { %v794_v19 = vadd.f32 %v783_v18, %v2320_v10  ;;  %v1996_v20 = vpop.f32.mrb[7].mxu0  ;;  %v787_v25 = vadd.f32 %v1871_v24, %v783_v18 }
 0x8fc   :  { %796 = vrot.lane.b32.xlu0 %v794_v19, %s2242_s3  ;;  %v1873_v28 = vmul.f32 -1.442695, %v787_v25 }
 0x8fd   :  { %v888_v21 = vpop.f32.mrb[6].mxu1 }
 0x8fe   :  { %v899_v22 = vadd.f32 %v888_v21, %v2322_v12  ;;  %v2003_v23 = vpop.f32.mrb[7].mxu1  ;;  %v892_v29 = vadd.f32 %v1874_v27, %v888_v21  ;;  %2154 = vpow2.f32 %v1873_v28 }
 0x900   :  { %901 = vrot.lane.b32.xlu1 %v899_v22, %s2242_s3  ;;  %v1876_v30 = vmul.f32 -1.442695, %v892_v29 }
 0x902   :  { %2156 = vpow2.f32 %v1876_v30 }
 0x908   :  { %v2155_v32 = vpop.eup %2154 }
 0x909   :  { %v791_v33 = vadd.f32 1.0, %v2155_v32 }
 0x90b   :  { %2158 = vrcp.f32 %v791_v33 }
 0x90c   :  { %v2157_v34 = vpop.eup %2156 }
 0x90d   :  { %v896_v35 = vadd.f32 1.0, %v2157_v34 }
 0x90f   :  { %2160 = vrcp.f32 %v896_v35 }
 0x915   :  { %v2159_v36 = vpop.eup %2158 }
 0x916   :  { %v806_v50 = vsub.f32 1.0, %v2159_v36  ;;  %v812_v52 = vmul.f32 %v2159_v36, %v2405_v7 }
 0x919   :  { %v2161_v39 = vpop.eup %2160 }
 0x91a   :  { %v911_v55 = vsub.f32 1.0, %v2161_v39  ;;  %v917_v57 = vmul.f32 %v2161_v39, %v2410_v15 }
 0x96e   :  { %v797_v37 = vpop.permute.xlu0 %796 }
 0x96f   :  { %v799_v38 = vmul.f32 %v2159_v36, %v797_v37 }
 0x971   :  { %801 = vrot.lane.b32.xlu0 %v799_v38, %s2241_s28 }
 0x972   :  { %v902_v40 = vpop.permute.xlu1 %901 }
 0x973   :  { %v904_v41 = vmul.f32 %v2161_v39, %v902_v40 }
 0x975   :  { %906 = vrot.lane.b32.xlu1 %v904_v41, %s2241_s28 }
 0x9e3   :  { %v802_v42 = vpop.permute.xlu0 %801 }
 0x9e4   :  { %v804_v43 = vadd.f32 %v1871_v24, %v802_v42 }
 0x9e6   :  { %2162 = vtanh.f32 %v804_v43 }
 0x9e7   :  { %v907_v45 = vpop.permute.xlu1 %906 }
 0x9e8   :  { %v909_v46 = vadd.f32 %v1874_v27, %v907_v45 }
 0x9ea   :  { %2164 = vtanh.f32 %v909_v46 }
 0x9f0   :  { %v2163_v47 = vpop.eup %2162 }
 0x9f1   :  { %808 = vrot.lane.b32.xlu0 %v2163_v47, %s2243_s9 }
 0x9f4   :  { %v2165_v48 = vpop.eup %2164 }
 0x9f5   :  { %913 = vrot.lane.b32.xlu1 %v2165_v48, %s2243_s9 }
 0xa63   :  { %v809_v51 = vpop.permute.xlu0 %808 }
 0xa64   :  { %v811_v53 = vmul.f32 %v809_v51, %v806_v50 }
 0xa66   :  { %v2439_v54 = vadd.f32 %v812_v52, %v811_v53 }
 0xa67   :  { %v914_v56 = vpop.permute.xlu1 %913 }
 0xa68   :  { %v916_v58 = vmul.f32 %v914_v56, %v911_v55  ;;  %937 = vrot.lane.b32.xlu0 %v2439_v54, %s2243_s9 }
 0xa6a   :  { %v2444_v59 = vadd.f32 %v917_v57, %v916_v58  ;;  %v1883_v57 = vld [vmem:[%s2632_s0 + $0x28] sm:$0x3f] }
 0xa6c   :  { %1042 = vrot.lane.b32.xlu1 %v2444_v59, %s2243_s9 }
 0xada   :  { %v938_v60 = vpop.permute.xlu0 %937 }
 0xadb   :  { %2009 = vmatmul.mubr.msk.f32.vlgmr.msra.gmra.mrb[8].mxu0 %vm31_vm1, %v938_v60 }
 0xadc   :  { %2092 = vmatpush3.bf16.msra.mxu0 %v2286_v4  ;;  %2022 = vmatprep.mubr.msk.f32.mxu0 %vm2239_vm0, %v2240_v5 }
 0xadd   :  { %2096 = vmatprep.subr.bf16.mxu0 %v2238_v3 }
 0xade   :  { %v1043_v61 = vpop.permute.xlu1 %1042 }
 0xadf   :  { %2016 = vmatmul.mubr.msk.f32.vlgmr.msra.gmra.mrb[8].mxu1 %vm31_vm1, %v1043_v61 }
 0xae0   :  { %2095 = vmatpush3.bf16.msra.mxu1 %v2297_v8  ;;  %2029 = vmatprep.mubr.msk.f32.mxu1 %vm2239_vm0, %v2240_v5 }
 0xae1   :  { %2099 = vmatprep.subr.bf16.mxu1 %v2238_v3 }
 0xbae   :  { %v1007_v62 = vpop.f32.mrb[8].mxu0 }
 0xbaf   :  { %v1018_v63 = vadd.f32 %v1007_v62, %v2320_v10  ;;  %v2010_v0 = vpop.f32.mrb[9].mxu0  ;;  %v1011_v11 = vadd.f32 %v1877_v9, %v1007_v62 }
 0xbb1   :  { %1020 = vrot.lane.b32.xlu0 %v1018_v63, %s2242_s3  ;;  %v1879_v14 = vmul.f32 -1.442695, %v1011_v11 }
 0xbb2   :  { %v1112_v1 = vpop.f32.mrb[8].mxu1 }
 0xbb3   :  { %v1123_v2 = vadd.f32 %v1112_v1, %v2322_v12  ;;  %v2017_v6 = vpop.f32.mrb[9].mxu1  ;;  %v1116_v16 = vadd.f32 %v1880_v13, %v1112_v1  ;;  %2166 = vpow2.f32 %v1879_v14 }
 0xbb5   :  { %1125 = vrot.lane.b32.xlu1 %v1123_v2, %s2242_s3  ;;  %v1882_v17 = vmul.f32 -1.442695, %v1116_v16 }
 0xbb7   :  { %2168 = vpow2.f32 %v1882_v17 }
 0xbbd   :  { %v2167_v18 = vpop.eup %2166 }
 0xbbe   :  { %v1015_v19 = vadd.f32 1.0, %v2167_v18 }
 0xbc0   :  { %2170 = vrcp.f32 %v1015_v19 }
 0xbc1   :  { %v2169_v20 = vpop.eup %2168 }
 0xbc2   :  { %v1120_v21 = vadd.f32 1.0, %v2169_v20 }
 0xbc4   :  { %2172 = vrcp.f32 %v1120_v21 }
 0xbca   :  { %v2171_v22 = vpop.eup %2170 }
 0xbcb   :  { %v1030_v36 = vsub.f32 1.0, %v2171_v22  ;;  %v1036_v38 = vmul.f32 %v2171_v22, %v2439_v54 }
 0xbce   :  { %v2173_v25 = vpop.eup %2172 }
 0xbcf   :  { %v1135_v41 = vsub.f32 1.0, %v2173_v25  ;;  %v1141_v43 = vmul.f32 %v2173_v25, %v2444_v59 }
 0xc23   :  { %v1021_v23 = vpop.permute.xlu0 %1020 }
 0xc24   :  { %v1023_v24 = vmul.f32 %v2171_v22, %v1021_v23 }
 0xc26   :  { %1025 = vrot.lane.b32.xlu0 %v1023_v24, %s2241_s28 }
 0xc27   :  { %v1126_v27 = vpop.permute.xlu1 %1125 }
 0xc28   :  { %v1128_v28 = vmul.f32 %v2173_v25, %v1126_v27 }
 0xc2a   :  { %1130 = vrot.lane.b32.xlu1 %v1128_v28, %s2241_s28 }
 0xc98   :  { %v1026_v29 = vpop.permute.xlu0 %1025 }
 0xc99   :  { %v1028_v30 = vadd.f32 %v1877_v9, %v1026_v29 }
 0xc9b   :  { %2174 = vtanh.f32 %v1028_v30 }
 0xc9c   :  { %v1131_v32 = vpop.permute.xlu1 %1130 }
 0xc9d   :  { %v1133_v33 = vadd.f32 %v1880_v13, %v1131_v32 }
 0xc9f   :  { %2176 = vtanh.f32 %v1133_v33 }
 0xca5   :  { %v2175_v34 = vpop.eup %2174 }
 0xca6   :  { %1032 = vrot.lane.b32.xlu0 %v2175_v34, %s2243_s9 }
 0xca9   :  { %v2177_v35 = vpop.eup %2176 }
 0xcaa   :  { %1137 = vrot.lane.b32.xlu1 %v2177_v35, %s2243_s9 }
 0xd18   :  { %v1033_v37 = vpop.permute.xlu0 %1032 }
 0xd19   :  { %v1035_v39 = vmul.f32 %v1033_v37, %v1030_v36 }
 0xd1b   :  { %v2473_v40 = vadd.f32 %v1036_v38, %v1035_v39 }
 0xd1c   :  { %v1138_v42 = vpop.permute.xlu1 %1137 }
 0xd1d   :  { %v1140_v45 = vmul.f32 %v1138_v42, %v1135_v41  ;;  %1161 = vrot.lane.b32.xlu0 %v2473_v40, %s2243_s9 }
 0xd1f   :  { %v2478_v46 = vadd.f32 %v1141_v43, %v1140_v45  ;;  %v1889_v43 = vld [vmem:[%s2632_s0 + $0x30] sm:$0x3f] }
 0xd21   :  { %1266 = vrot.lane.b32.xlu1 %v2478_v46, %s2243_s9 }
 0xd8f   :  { %v1162_v47 = vpop.permute.xlu0 %1161 }
 0xd90   :  { %2023 = vmatmul.mubr.msk.f32.vlgmr.msra.gmra.mrb[10].mxu0 %vm31_vm1, %v1162_v47 }
 0xd91   :  { %2098 = vmatpush3.bf16.msra.mxu0 %v2286_v4  ;;  %2036 = vmatprep.mubr.msk.f32.mxu0 %vm2239_vm0, %v2240_v5 }
 0xd92   :  { %2102 = vmatprep.subr.bf16.mxu0 %v2238_v3 }
 0xd93   :  { %v1267_v48 = vpop.permute.xlu1 %1266 }
 0xd94   :  { %2030 = vmatmul.mubr.msk.f32.vlgmr.msra.gmra.mrb[10].mxu1 %vm31_vm1, %v1267_v48 }
 0xd95   :  { %2101 = vmatpush3.bf16.msra.mxu1 %v2297_v8  ;;  %2043 = vmatprep.mubr.msk.f32.mxu1 %vm2239_vm0, %v2240_v5 }
 0xd96   :  { %2105 = vmatprep.subr.bf16.mxu1 %v2238_v3  ;;  %v1886_v3 = vld [vmem:[%s2633_s1 + $0x10] sm:$0x3f] }
 0xe63   :  { %v1231_v50 = vpop.f32.mrb[10].mxu0 }
 0xe64   :  { %v1242_v51 = vadd.f32 %v1231_v50, %v2320_v10  ;;  %v2024_v52 = vpop.f32.mrb[11].mxu0  ;;  %v1235_v58 = vadd.f32 %v1883_v57, %v1231_v50 }
 0xe66   :  { %1244 = vrot.lane.b32.xlu0 %v1242_v51, %s2242_s3  ;;  %v1885_v60 = vmul.f32 -1.442695, %v1235_v58 }
 0xe67   :  { %v1336_v53 = vpop.f32.mrb[10].mxu1 }
 0xe68   :  { %v1347_v55 = vadd.f32 %v1336_v53, %v2322_v12  ;;  %v2031_v56 = vpop.f32.mrb[11].mxu1  ;;  %v1340_v61 = vadd.f32 %v1886_v3, %v1336_v53  ;;  %2178 = vpow2.f32 %v1885_v60 }
 0xe6a   :  { %1349 = vrot.lane.b32.xlu1 %v1347_v55, %s2242_s3  ;;  %v1888_v62 = vmul.f32 -1.442695, %v1340_v61 }
 0xe6c   :  { %2180 = vpow2.f32 %v1888_v62 }
 0xe72   :  { %v2179_v63 = vpop.eup %2178 }
 0xe73   :  { %v1239_v0 = vadd.f32 1.0, %v2179_v63 }
 0xe75   :  { %2182 = vrcp.f32 %v1239_v0 }
 0xe76   :  { %v2181_v1 = vpop.eup %2180 }
 0xe77   :  { %v1344_v2 = vadd.f32 1.0, %v2181_v1 }
 0xe79   :  { %2184 = vrcp.f32 %v1344_v2 }
 0xe7f   :  { %v2183_v6 = vpop.eup %2182 }
 0xe80   :  { %v1254_v23 = vsub.f32 1.0, %v2183_v6  ;;  %v1260_v25 = vmul.f32 %v2183_v6, %v2473_v40 }
 0xe83   :  { %v2185_v13 = vpop.eup %2184 }
 0xe84   :  { %v1359_v29 = vsub.f32 1.0, %v2185_v13  ;;  %v1365_v32 = vmul.f32 %v2185_v13, %v2478_v46 }
 0xed8   :  { %v1245_v9 = vpop.permute.xlu0 %1244 }
 0xed9   :  { %v1247_v11 = vmul.f32 %v2183_v6, %v1245_v9 }
 0xedb   :  { %1249 = vrot.lane.b32.xlu0 %v1247_v11, %s2241_s28 }
 0xedc   :  { %v1350_v14 = vpop.permute.xlu1 %1349 }
 0xedd   :  { %v1352_v16 = vmul.f32 %v2185_v13, %v1350_v14 }
 0xedf   :  { %1354 = vrot.lane.b32.xlu1 %v1352_v16, %s2241_s28 }
 0xf4d   :  { %v1250_v17 = vpop.permute.xlu0 %1249 }
 0xf4e   :  { %v1252_v18 = vadd.f32 %v1883_v57, %v1250_v17 }
 0xf50   :  { %2186 = vtanh.f32 %v1252_v18 }
 0xf51   :  { %v1355_v19 = vpop.permute.xlu1 %1354 }
 0xf52   :  { %v1357_v20 = vadd.f32 %v1886_v3, %v1355_v19 }
 0xf54   :  { %2188 = vtanh.f32 %v1357_v20 }
 0xf5a   :  { %v2187_v21 = vpop.eup %2186 }
 0xf5b   :  { %1256 = vrot.lane.b32.xlu0 %v2187_v21, %s2243_s9 }
 0xf5e   :  { %v2189_v22 = vpop.eup %2188 }
 0xf5f   :  { %1361 = vrot.lane.b32.xlu1 %v2189_v22, %s2243_s9 }
 0xfcd   :  { %v1257_v24 = vpop.permute.xlu0 %1256 }
 0xfce   :  { %v1259_v27 = vmul.f32 %v1257_v24, %v1254_v23  ;;  %v2244_v23 = vmov 0  }
 0xfcf   :  { %2116 = vset.pattern.permute.xlu1 %v2244_v23  ;;  %2117 = vset.pattern.permute.xlu0 %v2244_v23 }
 0xfd0   :  { %v2507_v28 = vadd.f32 %v1260_v25, %v1259_v27 }
 0xfd1   :  { %v1362_v30 = vpop.permute.xlu1 %1361 }
 0xfd2   :  { %v1364_v33 = vmul.f32 %v1362_v30, %v1359_v29  ;;  %1385 = vrot.lane.b32.xlu0 %v2507_v28, %s2243_s9  ;;  %v29_v29 = vld [vmem:[%s2636_s4] sm:$0x3f] }
 0xfd3   :  { %vm140_vm2 = vcmp.gt.s32.totalorder %v29_v29, 0  ;;  %vm590_vm3 = vcmp.gt.s32.totalorder %v29_v29, 2  ;;  %vm814_vm4 = vcmp.gt.s32.totalorder %v29_v29, 3  ;;  %vm1038_vm5 = vcmp.gt.s32.totalorder %v29_v29, 4 }
 0xfd4   :  { %v2512_v34 = vadd.f32 %v1365_v32, %v1364_v33  ;;  %vm1486_vm6 = vcmp.gt.s32.totalorder %v29_v29, 6  ;;  %vm366_vm7 = vcmp.gt.s32.totalorder %v29_v29, 1  ;;  %vm1262_vm8 = vcmp.gt.s32.totalorder %v29_v29, 5 }
 0xfd5   :  { %vm1710_vm9 = vcmp.gt.s32.totalorder %v29_v29, 7 }
 0xfd6   :  { %1490 = vrot.lane.b32.xlu1 %v2512_v34, %s2243_s9 }
0x1044   :  { %v1386_v35 = vpop.permute.xlu0 %1385 }
0x1045   :  { %2037 = vmatmul.mubr.msk.f32.vlgmr.msra.gmra.mrb[12].mxu0 %vm31_vm1, %v1386_v35  ;;  %v250_v35 = vsel %vm140_vm2, 1, %v2244_v23 }
0x1046   :  { %2104 = vmatpush3.bf16.msra.mxu0 %v2286_v4  ;;  %2050 = vmatprep.mubr.msk.f32.mxu0 %vm2239_vm0, %v2240_v5 }
0x1048   :  { %v1491_v36 = vpop.permute.xlu1 %1490 }
0x1049   :  { %2044 = vmatmul.mubr.msk.f32.vlgmr.msra.gmra.mrb[12].mxu1 %vm31_vm1, %v1491_v36  ;;  %v921_v36 = vsel %vm814_vm4, 1, %v2244_v23 }
0x104a   :  { %2107 = vmatpush3.bf16.msra.mxu1 %v2297_v8  ;;  %2057 = vmatprep.mubr.msk.f32.mxu1 %vm2239_vm0, %v2240_v5  ;;  %v1892_v5 = vld [vmem:[%s2633_s1 + $0x8] sm:$0x3f] }
0x1118   :  { %v1455_v37 = vpop.f32.mrb[12].mxu0 }
0x1119   :  { %v1466_v38 = vadd.f32 %v1455_v37, %v2320_v10  ;;  %v2038_v39 = vpop.f32.mrb[13].mxu0  ;;  %v1459_v8 = vadd.f32 %v1889_v43, %v1455_v37  ;;  %v1145_v37 = vsel %vm1038_vm5, 1, %v2244_v23 }
0x111b   :  { %1468 = vrot.lane.b32.xlu0 %v1466_v38, %s2242_s3  ;;  %v1891_v45 = vmul.f32 -1.442695, %v1459_v8  ;;  %v1895_v38 = vld [vmem:[%s2632_s0 + $0x38] sm:$0x3f]  ;;  %s2245_s0 = smov [#allocation2]  }
0x111c   :  { %v1560_v41 = vpop.f32.mrb[12].mxu1 }
0x111d   :  { %v1571_v4 = vadd.f32 %v1560_v41, %v2322_v12  ;;  %v2045_v42 = vpop.f32.mrb[13].mxu1  ;;  %v1564_v47 = vadd.f32 %v1892_v5, %v1560_v41  ;;  %2190 = vpow2.f32 %v1891_v45 }
0x111f   :  { %1573 = vrot.lane.b32.xlu1 %v1571_v4, %s2242_s3  ;;  %v1894_v48 = vmul.f32 -1.442695, %v1564_v47  ;;  %v1711_v4 = vld [vmem:[%s2633_s1] sm:$0x3f]  ;;  %s1843_s1 = sshll.u32 %s2245_s0, 4  ;;  %s1844_s1 = int_to_ptr.vmem [resolvable:$true] %s1843_s1 }
0x1120   :  { %p2219_p1 = scmp.lt.s32.totalorder %s1844_s1, %s1844_s1 }
0x1121   :  { %2192 = vpow2.f32 %v1894_v48 }
0x1127   :  { %v2191_v50 = vpop.eup %2190 }
0x1128   :  { %v1463_v51 = vadd.f32 1.0, %v2191_v50 }
0x112a   :  { %2194 = vrcp.f32 %v1463_v51 }
0x112b   :  { %v2193_v52 = vpop.eup %2192 }
0x112c   :  { %v1568_v53 = vadd.f32 1.0, %v2193_v52  ;;  %v473_v52 = vsel %vm366_vm7, 1, %v2244_v23 }
0x112e   :  { %2196 = vrcp.f32 %v1568_v53 }
0x1134   :  { %v2195_v55 = vpop.eup %2194 }
0x1135   :  { %v1478_v6 = vsub.f32 1.0, %v2195_v55  ;;  %v1484_v11 = vmul.f32 %v2195_v55, %v2507_v28 }
0x1138   :  { %v2197_v58 = vpop.eup %2196 }
0x1139   :  { %v1583_v16 = vsub.f32 1.0, %v2197_v58  ;;  %v1589_v18 = vmul.f32 %v2197_v58, %v2512_v34 }
0x118d   :  { %v1469_v56 = vpop.permute.xlu0 %1468 }
0x118e   :  { %v1471_v57 = vmul.f32 %v2195_v55, %v1469_v56 }
0x1190   :  { %1473 = vrot.lane.b32.xlu0 %v1471_v57, %s2241_s28  ;;  %v1369_v57 = vsel %vm1262_vm8, 1, %v2244_v23 }
0x1191   :  { %v1574_v3 = vpop.permute.xlu1 %1573 }
0x1192   :  { %v1576_v60 = vmul.f32 %v2197_v58, %v1574_v3  ;;  %v248_v58 = vsub.s32 8, %v29_v29  ;;  %v1816_v3 = vsel %vm1710_vm9, 1, %v2244_v23 }
0x1194   :  { %1578 = vrot.lane.b32.xlu1 %v1576_v60, %s2241_s28  ;;  %vm249_vm10 = vcmp.le.s32.totalorder %v248_v58, 0  ;;  %vm695_vm11 = vcmp.le.s32.totalorder %v248_v58, 2  ;;  %vm1143_vm12 = vcmp.le.s32.totalorder %v248_v58, 4  ;;  %vm1591_vm13 = vcmp.le.s32.totalorder %v248_v58, 6 }
0x1195   :  { %v256_v60 = vsel %vm249_vm10, 1, %v2244_v23  ;;  %vm471_vm14 = vcmp.le.s32.totalorder %v248_v58, 1  ;;  %vm919_vm15 = vcmp.le.s32.totalorder %v248_v58, 3  ;;  %vm1367_vm0 = vcmp.le.s32.totalorder %v248_v58, 5 }
0x1196   :  { %vm1814_vm2 = vcmp.le.s32.totalorder %v248_v58, 7 }
0x1202   :  { %v1474_v61 = vpop.permute.xlu0 %1473 }
0x1203   :  { %v1476_v62 = vadd.f32 %v1889_v43, %v1474_v61  ;;  %v704_v61 = vsel %vm695_vm11, 1, %v2244_v23 }
0x1205   :  { %2198 = vtanh.f32 %v1476_v62  ;;  %v1152_v62 = vsel %vm1143_vm12, 1, %v2244_v23 }
0x1206   :  { %v1579_v63 = vpop.permute.xlu1 %1578 }
0x1207   :  { %v1581_v0 = vadd.f32 %v1892_v5, %v1579_v63  ;;  %v1600_v63 = vsel %vm1591_vm13, 1, %v2244_v23 }
0x1209   :  { %2200 = vtanh.f32 %v1581_v0 }
0x120f   :  { %v2199_v1 = vpop.eup %2198 }
0x1210   :  { %1480 = vrot.lane.b32.xlu0 %v2199_v1, %s2243_s9 }
0x1213   :  { %v2201_v2 = vpop.eup %2200 }
0x1214   :  { %1585 = vrot.lane.b32.xlu1 %v2201_v2, %s2243_s9 }
0x1282   :  { %v1481_v9 = vpop.permute.xlu0 %1480 }
0x1283   :  { %v1483_v13 = vmul.f32 %v1481_v9, %v1478_v6  ;;  %v480_v6 = vsel %vm471_vm14, 1, %v2244_v23 }
0x1285   :  { %v2539_v14 = vadd.f32 %v1484_v11, %v1483_v13  ;;  %v928_v11 = vsel %vm919_vm15, 1, %v2244_v23 }
0x1286   :  { %v1586_v17 = vpop.permute.xlu1 %1585 }
0x1287   :  { %v1588_v19 = vmul.f32 %v1586_v17, %v1583_v16  ;;  %1609 = vrot.lane.b32.xlu0 %v2539_v14, %s2243_s9  ;;  %v1376_v17 = vsel %vm1367_vm0, 1, %v2244_v23 }
0x1289   :  { %v2544_v20 = vadd.f32 %v1589_v18, %v1588_v19  ;;  %v1823_v18 = vsel %vm1814_vm2, 1, %v2244_v23 }
0x128b   :  { %1713 = vrot.lane.b32.xlu1 %v2544_v20, %s2243_s9 }
0x12f9   :  { %v1610_v21 = vpop.permute.xlu0 %1609 }
0x12fa   :  { %2051 = vmatmul.mubr.msk.f32.vlgmr.msra.gmra.mrb[14].mxu0 %vm31_vm1, %v1610_v21 }
0x12fd   :  { %v1714_v22 = vpop.permute.xlu1 %1713 }
0x12fe   :  { %2058 = vmatmul.mubr.msk.f32.vlgmr.msra.gmra.mrb[14].mxu1 %vm31_vm1, %v1714_v22 }
0x13cd   :  { %v1679_v24 = vpop.f32.mrb[14].mxu0 }
0x13ce   :  { %v1690_v25 = vadd.f32 %v1679_v24, %v2320_v10  ;;  %v2052_v27 = vpop.f32.mrb[15].mxu0  ;;  %v697_v10 = vsel %vm590_vm3, 1, %v2244_v23  ;;  %v1683_v39 = vadd.f32 %v1895_v38, %v1679_v24 }
0x13d0   :  { %1692 = vrot.lane.b32.xlu0 %v1690_v25, %s2242_s3  ;;  %v1897_v41 = vmul.f32 -1.442695, %v1683_v39 }
0x13d1   :  { %v1783_v30 = vpop.f32.mrb[14].mxu1 }
0x13d2   :  { %v1794_v32 = vadd.f32 %v1783_v30, %v2322_v12  ;;  %v2059_v33 = vpop.f32.mrb[15].mxu1  ;;  %v1593_v12 = vsel %vm1486_vm6, 1, %v2244_v23  ;;  %2202 = vpow2.f32 %v1897_v41  ;;  %v1787_v42 = vadd.f32 %v1783_v30, %v1711_v4 }
0x13d4   :  { %1796 = vrot.lane.b32.xlu1 %v1794_v32, %s2242_s3  ;;  %v1899_v43 = vmul.f32 -1.442695, %v1787_v42 }
0x13d6   :  { %2204 = vpow2.f32 %v1899_v43 }
0x13d8   :  { %252 = vperm.xlu1 %2116, %v250_v35  }
0x13dc   :  { %699 = vperm.xlu1 %2116, %v697_v10   ;;  %v2203_v8 = vpop.eup %2202 }
0x13dd   :  { %v1687_v5 = vadd.f32 1.0, %v2203_v8 }
0x13df   :  { %2206 = vrcp.f32 %v1687_v5 }
0x13e0   :  { %923 = vperm.xlu1 %2116, %v921_v36   ;;  %v2205_v45 = vpop.eup %2204 }
0x13e1   :  { %v1791_v47 = vadd.f32 1.0, %v2205_v45 }
0x13e3   :  { %2208 = vrcp.f32 %v1791_v47 }
0x13e4   :  { %1147 = vperm.xlu1 %2116, %v1145_v37  }
0x13e8   :  { %1595 = vperm.xlu1 %2116, %v1593_v12  }
0x13e9   :  { %v2570_v48 = vpop.eup %2206 }
0x13ed   :  { %v2575_v55 = vpop.eup %2208 }
0x1442   :  { %v1693_v50 = vpop.permute.xlu0 %1692 }
0x1443   :  { %v1695_v51 = vmul.f32 %v2570_v48, %v1693_v50 }
0x1445   :  { %1697 = vrot.lane.b32.xlu0 %v1695_v51, %s2241_s28 }
0x1446   :  { %v1797_v53 = vpop.permute.xlu1 %1796 }
0x1447   :  { %v1799_v56 = vmul.f32 %v2575_v55, %v1797_v53 }
0x1449   :  { %475 = vperm.xlu0 %2117, %v473_v52  }
0x144d   :  { %1801 = vrot.lane.b32.xlu0 %v1799_v56, %s2241_s28  ;;  %s2214_s28 = scalar_lea.vmem %s1844_s1, 128 }
0x144e   :  { %p2215_p0 = scmp.ne.s32.totalorder %s1844_s1, %s2214_s28  ;;  %p2220_p2 = scmp.lt.s32.totalorder %s2214_s28, %s2214_s28 }
0x1450   :  { %p2221_p3 = por %p2220_p2, %p2219_p1 }
0x1451   :  { %1371 = vperm.xlu0 %2117, %v1369_v57  }
0x1452   :  { %p2222_p4 = pnand %p2221_p3, %p2215_p0 }
0x1455   :  { %1818 = vperm.xlu0 %2117, %v1816_v3  }
0x1457   :  { %v2591_v21 = vpop.permute.xlu1 %252 }
0x1458   :  { %vm254_vm3 = vcmp.eq.s32.totalorder %v2591_v21, 1 }
0x1459   :  { %258 = vperm.xlu0 %2117, %v256_v60   ;;  %v255_v22 = vsel %vm254_vm3, %v2338_v44, -inf }
0x145a   :  { %v472_v24 = vmax.f32 %v255_v22, %v2371_v26 }
0x145b   :  { %v700_v27 = vpop.permute.xlu1 %699 }
0x145c   :  { %vm701_vm5 = vcmp.eq.s32.totalorder %v700_v27, 1 }
0x145d   :  { %706 = vperm.xlu0 %2117, %v704_v61  }
0x145f   :  { %v924_v30 = vpop.permute.xlu1 %923 }
0x1460   :  { %vm925_vm6 = vcmp.eq.s32.totalorder %v924_v30, 1 }
0x1461   :  { %1154 = vperm.xlu0 %2117, %v1152_v62   ;;  %v1806_v62 = vsub.f32 1.0, %v2575_v55 }
0x1463   :  { %v1148_v35 = vpop.permute.xlu1 %1147 }
0x1464   :  { %vm1149_vm7 = vcmp.eq.s32.totalorder %v1148_v35, 1 }
0x1465   :  { %1602 = vperm.xlu0 %2117, %v1600_v63  }
0x1467   :  { %v1596_v26 = vpop.permute.xlu1 %1595 }
0x1468   :  { %vm1597_vm9 = vcmp.eq.s32.totalorder %v1596_v26, 1 }
0x14b7   :  { %v1698_v0 = vpop.permute.xlu0 %1697 }
0x14b8   :  { %v1700_v1 = vadd.f32 %v1895_v38, %v1698_v0 }
0x14ba   :  { %2210 = vtanh.f32 %v1700_v1 }
0x14c4   :  { %v2211_v2 = vpop.eup %2210 }
0x14c5   :  { %1704 = vrot.lane.b32.xlu1 %v2211_v2, %s2243_s9 }
0x14c8   :  { %v476_v9 = vpop.permute.xlu0 %475 }
0x14c9   :  { %482 = vperm.xlu1 %2116, %v480_v6   ;;  %vm477_vm4 = vcmp.eq.s32.totalorder %v476_v9, 1 }
0x14ca   :  { %v478_v25 = vsel %vm477_vm4, %v472_v24, %v255_v22 }
0x14cb   :  { %v696_v29 = vmax.f32 %v478_v25, %v2405_v7  ;;  %v1702_v7 = vsub.f32 1.0, %v2570_v48 }
0x14cc   :  { %v1802_v13 = vpop.permute.xlu0 %1801 }
0x14cd   :  { %v1804_v16 = vadd.f32 %v1802_v13, %v1711_v4  ;;  %930 = vperm.xlu1 %2116, %v928_v11   ;;  %v702_v23 = vsel %vm701_vm5, %v696_v29, %v478_v25  ;;  %vm1835_vm5 = vcmask 259072  }
0x14ce   :  { %v920_v32 = vmax.f32 %v702_v23, %v2439_v54  ;;  %v1708_v54 = vmul.f32 %v2570_v48, %v2539_v14 }
0x14cf   :  { %2212 = vtanh.f32 %v1804_v16 }
0x14d0   :  { %v926_v33 = vsel %vm925_vm6, %v920_v32, %v702_v23  ;;  %v1372_v44 = vpop.permute.xlu0 %1371 }
0x14d1   :  { %1378 = vperm.xlu1 %2116, %v1376_v17   ;;  %v1144_v10 = vmax.f32 %v926_v33, %v2473_v40  ;;  %vm1373_vm8 = vcmp.eq.s32.totalorder %v1372_v44, 1 }
0x14d3   :  { %v1150_v36 = vsel %vm1149_vm7, %v1144_v10, %v926_v33 }
0x14d4   :  { %v1368_v37 = vmax.f32 %v1150_v36, %v2507_v28  ;;  %v1819_v42 = vpop.permute.xlu0 %1818 }
0x14d5   :  { %1825 = vperm.xlu1 %2116, %v1823_v18   ;;  %vm1820_vm10 = vcmp.eq.s32.totalorder %v1819_v42, 1 }
0x14d6   :  { %v1374_v12 = vsel %vm1373_vm8, %v1368_v37, %v1150_v36 }
0x14d7   :  { %v1592_v38 = vmax.f32 %v1374_v12, %v2539_v14 }
0x14d8   :  { %v259_v28 = vpop.permute.xlu0 %258 }
0x14d9   :  { %v2213_v19 = vpop.eup %2212  ;;  %v1598_v40 = vsel %vm1597_vm9, %v1592_v38, %v1374_v12  ;;  %vm260_vm11 = vcmp.eq.s32.totalorder %v259_v28, 1 }
0x14da   :  { %1808 = vrot.lane.b32.xlu0 %v2213_v19, %s2243_s9  ;;  %v261_v45 = vsel %vm260_vm11, %v2342_v49, -inf }
0x14db   :  { %v479_v47 = vmax.f32 %v261_v45, %v2376_v31 }
0x14dc   :  { %v707_v48 = vpop.permute.xlu0 %706 }
0x14dd   :  { %vm708_vm13 = vcmp.eq.s32.totalorder %v707_v48, 1 }
0x14e0   :  { %v1155_v58 = vpop.permute.xlu0 %1154 }
0x14e1   :  { %vm1156_vm15 = vcmp.eq.s32.totalorder %v1155_v58, 1 }
0x14e4   :  { %v1603_v31 = vpop.permute.xlu0 %1602 }
0x14e5   :  { %vm1604_vm2 = vcmp.eq.s32.totalorder %v1603_v31, 1 }
0x1537   :  { %v1705_v39 = vpop.permute.xlu1 %1704 }
0x1538   :  { %v1707_v41 = vmul.f32 %v1705_v39, %v1702_v7 }
0x153a   :  { %v1709_v4 = vadd.f32 %v1708_v54, %v1707_v41 }
0x153c   :  { %v1815_v43 = vmax.f32 %v1598_v40, %v1709_v4 }
0x153e   :  { %v1821_v8 = vsel %vm1820_vm10, %v1815_v43, %v1598_v40 }
0x153f   :  { %1830 = vrot.lane.b32.xlu1 %v1821_v8, %s2243_s9 }
0x1548   :  { %v483_v5 = vpop.permute.xlu1 %482 }
0x1549   :  { %vm484_vm12 = vcmp.eq.s32.totalorder %v483_v5, 1 }
0x154a   :  { %v485_v50 = vsel %vm484_vm12, %v479_v47, %v261_v45 }
0x154b   :  { %v703_v14 = vmax.f32 %v485_v50, %v2410_v15 }
0x154c   :  { %v931_v52 = vpop.permute.xlu1 %930  ;;  %v1809_v15 = vpop.permute.xlu0 %1808 }
0x154d   :  { %v709_v51 = vsel %vm708_vm13, %v703_v14, %v485_v50  ;;  %vm932_vm14 = vcmp.eq.s32.totalorder %v931_v52, 1  ;;  %v1811_v0 = vmul.f32 %v1809_v15, %v1806_v62 }
0x154e   :  { %v927_v53 = vmax.f32 %v709_v51, %v2444_v59  ;;  %v1812_v59 = vmul.f32 %v2575_v55, %v2544_v20 }
0x1550   :  { %v933_v56 = vsel %vm932_vm14, %v927_v53, %v709_v51  ;;  %v1379_v49 = vpop.permute.xlu1 %1378  ;;  %v1813_v1 = vadd.f32 %v1812_v59, %v1811_v0 }
0x1551   :  { %v1151_v57 = vmax.f32 %v933_v56, %v2478_v46  ;;  %vm1380_vm0 = vcmp.eq.s32.totalorder %v1379_v49, 1 }
0x1553   :  { %v1157_v3 = vsel %vm1156_vm15, %v1151_v57, %v933_v56 }
0x1554   :  { %v1375_v60 = vmax.f32 %v1157_v3, %v2512_v34  ;;  %v1826_v2 = vpop.permute.xlu1 %1825 }
0x1555   :  { %vm1827_vm4 = vcmp.eq.s32.totalorder %v1826_v2, 1 }
0x1556   :  { %v1381_v61 = vsel %vm1380_vm0, %v1375_v60, %v1157_v3 }
0x1557   :  { %v1599_v63 = vmax.f32 %v1381_v61, %v2544_v20 }
0x1559   :  { %v1605_v46 = vsel %vm1604_vm2, %v1599_v63, %v1381_v61 }
0x155a   :  { %v1822_v6 = vmax.f32 %v1605_v46, %v1813_v1 }
0x155c   :  { %v1828_v34 = vsel %vm1827_vm4, %v1822_v6, %v1605_v46 }
0x15b1   :  { %v1831_v9 = vpop.permute.xlu1 %1830 }
0x15b2   :  { %v1833_v11 = vsel %vm31_vm1, %v1831_v9, %v1828_v34 }
0x15b3   :  { %v1834_v13 = vsel %vm254_vm3, %v1833_v11, 0.0 }
0x15b4   :  { %1836 = vst.msk [vmem:[#allocation2] sm:$0x3f] %vm1835_vm5, %v1834_v13 }
0x15b5   :  { %2225 = shalt.err (!%p2222_p4)
}
0x15b6   :  { %s2226_s15 = scalar_lea.hbm %s2637_s5, 128 }
0x15b7   :  { %p2227_p5 = scmp.ne.s32.totalorder %s2637_s5, %s2226_s15  ;;  %p2230_p6 = scmp.lt.u32.totalorder %s2226_s15, %s2637_s5 }
0x15b9   :  { %p2232_p7 = pnand %p2230_p6, %p2227_p5 }
0x15bb   :  { %2235 = shalt.err (!%p2232_p7)
}
0x15bc   :  { %1846 = dma.vmem_to_hbm [thread:$0]  %s1844_s1, 128, %s2637_s5, [#allocation3]  }
0x15bd   :  { %2236 = dma.done.wait [#allocation3], 128  }
0x15be   :  { %2237 = vsyncadd [#allocation3], 4294967168 }
0x15bf   :  { %1850 = vsyncpa [#allocation3], 1 }

</bundles_post_ra>
